<compile_context>
chip_gen: v7x
topology: tpu7x:2x2x1
jax: 0.10.0
libtpu: 0.0.40
codegen_flags: <defaults>
</compile_context>

<pallas_src>
import jax
import jax.numpy as jnp
from jax import lax
from jax.experimental import pallas as pl
from jax.experimental.pallas import tpu as pltpu

N_MODEL = 48
N_HEADS = 12
KEY_DIM = N_MODEL // N_HEADS   # 4
FF_DIM = 50
SEQ = 8
LN_EPS = 1e-5


def _layer_norm(z, gamma, beta):
    mean = jnp.mean(z, axis=-1, keepdims=True)
    var = jnp.mean(jnp.square(z - mean), axis=-1, keepdims=True)
    return (z - mean) * lax.rsqrt(var + LN_EPS) * gamma + beta


def transformer_layer_kernel(x_ref, wkqv_ref, bkqv_ref, wpool_ref, wff1_ref,
                             bff1_ref, wff2_ref, params_ref, o_ref):
    S, D = x_ref.shape
    H, Kd = N_HEADS, KEY_DIM

    x = x_ref[...]                                                          # (S, D)

    # ---- fused QKV projection for all 12 heads: one (S,D)x(D,3D) matmul ----
    kqv = jnp.dot(x, wkqv_ref[...], preferred_element_type=jnp.float32) + bkqv_ref[...]
    keys, queries, values = kqv[:, :D], kqv[:, D:2 * D], kqv[:, 2 * D:]     # (S, D) each

    # ---- packed small parameters ----
    b_pool = params_ref[0:1, :]
    ln1_g, ln1_b = params_ref[1:2, :], params_ref[2:3, :]
    b_ff2 = params_ref[3:4, :]
    ln2_g, ln2_b = params_ref[4:5, :], params_ref[5:6, :]

    # ---- per-head attention with the pooler folded into the loop ----
    # concat(heads) @ Wp.T + bp  ==  sum_h head_h @ Wp.T[h*Kd:(h+1)*Kd, :] + bp
    pooled = jnp.zeros((S, D), jnp.float32)
    for h in range(H):
        k_h = keys[:, h * Kd:(h + 1) * Kd]                                  # (S, Kd)
        q_h = queries[:, h * Kd:(h + 1) * Kd]
        v_h = values[:, h * Kd:(h + 1) * Kd]
        # keys @ queries.T (no 1/sqrt(d) scale, as in the module), no transpose.
        scores = lax.dot_general(k_h, q_h, (((1,), (1,)), ((), ())),
                                 preferred_element_type=jnp.float32)        # (S, S)
        m = jnp.max(scores, axis=-1, keepdims=True)
        p = jnp.exp(scores - m)
        attn = p * pl.reciprocal(jnp.sum(p, axis=-1, keepdims=True), approx=False)
        head = jnp.dot(attn, v_h, preferred_element_type=jnp.float32)       # (S, Kd)
        pooled = pooled + jnp.dot(head, wpool_ref[h],                       # (Kd, D)
                                  preferred_element_type=jnp.float32)
    pooled = pooled + b_pool

    # ---- residual + LayerNorm 1 (PoolHeads) ----
    y1 = _layer_norm(pooled + x, ln1_g, ln1_b)

    # ---- feed-forward ----
    hid = jnp.dot(y1, wff1_ref[...], preferred_element_type=jnp.float32) + bff1_ref[...]
    hid = jnp.maximum(hid, 0.0)
    ffn = jnp.dot(hid, wff2_ref[...], preferred_element_type=jnp.float32) + b_ff2

    # ---- residual + LayerNorm 2 (FullyConnected) ----
    o_ref[...] = _layer_norm(ffn + y1, ln2_g, ln2_b)


def transformer_layer(x, w_kqv, b_kqv, w_pool_heads, w_ff1, b_ff1, w_ff2, params):
    """x: (S, D). Returns (S, D). All weights pre-packed/pre-transposed on host."""
    S, D = x.shape
    full = lambda shape: pl.BlockSpec(shape, lambda: (0,) * len(shape))
    return pl.pallas_call(
        transformer_layer_kernel,
        out_shape=jax.ShapeDtypeStruct((S, D), jnp.float32),
        grid=(),  # tiny problem: single program, everything resident in VMEM
        in_specs=[
            full(x.shape), full(w_kqv.shape), full(b_kqv.shape),
            full(w_pool_heads.shape), full(w_ff1.shape), full(b_ff1.shape),
            full(w_ff2.shape), full(params.shape),
        ],
        out_specs=full((S, D)),
    )(x, w_kqv, b_kqv, w_pool_heads, w_ff1, b_ff1, w_ff2, params)


if __name__ == "__main__":
    root = jax.random.PRNGKey(0)
    _keys = iter(jax.random.split(root, 64))
    nk = lambda: next(_keys)

    x = jax.random.normal(nk(), (SEQ, N_MODEL), dtype=jnp.float32)

    def linear_params(k, out_dim, in_dim):
        k1, k2 = jax.random.split(k)
        bound = 1.0 / float(jnp.sqrt(in_dim))
        w = jax.random.uniform(k1, (out_dim, in_dim), jnp.float32, -bound, bound)
        b = jax.random.uniform(k2, (out_dim,), jnp.float32, -bound, bound)
        return w, b  # PyTorch Linear layout: weight (out, in), bias (out,)

    head_params = []
    for _ in range(N_HEADS):
        wk, bk = linear_params(nk(), KEY_DIM, N_MODEL)
        wq, bq = linear_params(nk(), KEY_DIM, N_MODEL)
        wv, bv = linear_params(nk(), KEY_DIM, N_MODEL)
        head_params.append((wk, bk, wq, bq, wv, bv))

    wp, bp = linear_params(nk(), N_MODEL, N_MODEL)
    w1, b1 = linear_params(nk(), FF_DIM, N_MODEL)
    w2, b2 = linear_params(nk(), N_MODEL, FF_DIM)
    ln1_g = 1.0 + 0.1 * jax.random.normal(nk(), (N_MODEL,), jnp.float32)
    ln1_b = 0.1 * jax.random.normal(nk(), (N_MODEL,), jnp.float32)
    ln2_g = 1.0 + 0.1 * jax.random.normal(nk(), (N_MODEL,), jnp.float32)
    ln2_b = 0.1 * jax.random.normal(nk(), (N_MODEL,), jnp.float32)

    # ---- host-side packing for the fused kernel ----
    wk_all = jnp.concatenate([hp[0].T for hp in head_params], axis=1)   # (D, H*Kd)
    wq_all = jnp.concatenate([hp[2].T for hp in head_params], axis=1)
    wv_all = jnp.concatenate([hp[4].T for hp in head_params], axis=1)
    w_kqv = jnp.concatenate([wk_all, wq_all, wv_all], axis=1)            # (48, 144)
    b_kqv = jnp.concatenate(
        [jnp.concatenate([hp[1] for hp in head_params]),
         jnp.concatenate([hp[3] for hp in head_params]),
         jnp.concatenate([hp[5] for hp in head_params])]).reshape(1, 3 * N_MODEL)

    w_pool_heads = wp.T.reshape(N_HEADS, KEY_DIM, N_MODEL)               # Wp.T rows per head
    w_ff1 = w1.T                                                         # (48, 50)
    b_ff1 = b1.reshape(1, FF_DIM)
    w_ff2 = w2.T                                                         # (50, 48)
    params = jnp.stack([bp, ln1_g, ln1_b, b2, ln2_g, ln2_b], axis=0)     # (6, 48)

    out = transformer_layer(x, w_kqv, b_kqv, w_pool_heads, w_ff1, b_ff1, w_ff2, params)
    out = jax.block_until_ready(out)

    # ---- pure-JAX reference: straight transcription of the PyTorch module ----
    def reference(x):
        heads = []
        for (wk, bk, wq, bq, wv, bv) in head_params:
            k = x @ wk.T + bk
            q = x @ wq.T + bq
            v = x @ wv.T + bv
            a = jax.nn.softmax(k @ q.T, axis=-1)
            heads.append(a @ v)
        pooled = jnp.concatenate(heads, axis=-1) @ wp.T + bp
        y1 = _layer_norm(pooled + x, ln1_g, ln1_b)
        hid = jax.nn.relu(y1 @ w1.T + b1)
        ffn = hid @ w2.T + b2
        return _layer_norm(ffn + y1, ln2_g, ln2_b)

    ref = reference(x)
    assert out.shape == (SEQ, N_MODEL)
    # 1e-4 tolerance: pooler is accumulated per-head inside the kernel (different
    # f32 summation order than the single concat@Wp.T matmul in the reference).
    assert jnp.allclose(out, ref, atol=1e-4, rtol=1e-4), (
        f"mismatch vs reference, max abs err = {float(jnp.max(jnp.abs(out - ref)))}")

    print("KERNEL_OK")
</pallas_src>

<mosaic_0001>
module attributes {stable_mosaic.version = 11 : i64} {
  func.func @transformer_layer_kernel(%arg0: memref<8x48xf32, #tpu.memory_space<vmem>>, %arg1: memref<48x144xf32, #tpu.memory_space<vmem>>, %arg2: memref<1x144xf32, #tpu.memory_space<vmem>>, %arg3: memref<12x4x48xf32, #tpu.memory_space<vmem>>, %arg4: memref<48x50xf32, #tpu.memory_space<vmem>>, %arg5: memref<1x50xf32, #tpu.memory_space<vmem>>, %arg6: memref<50x48xf32, #tpu.memory_space<vmem>>, %arg7: memref<6x48xf32, #tpu.memory_space<vmem>>, %arg8: memref<8x48xf32, #tpu.memory_space<vmem>>) attributes {dimension_semantics = [], scalar_prefetch = 0 : i64, scratch_operands = 0 : i64, tpu.core_type = #tpu.core_type<tc>} {
    %c0 = arith.constant 0 : index
    %c0_0 = arith.constant 0 : index
    %0 = vector.load %arg0[%c0, %c0_0] : memref<8x48xf32, #tpu.memory_space<vmem>>, vector<8x48xf32>
    %c0_1 = arith.constant 0 : index
    %c0_2 = arith.constant 0 : index
    %1 = vector.load %arg1[%c0_1, %c0_2] : memref<48x144xf32, #tpu.memory_space<vmem>>, vector<48x144xf32>
    %cst = arith.constant dense<0.000000e+00> : vector<8x144xf32>
    %2 = tpu.matmul %0, %1, %cst {dimension_numbers = #tpu.dot_dimension_numbers<[1], [0], [0], [1], [0, 0, 1, 1], [], []>} : vector<8x48xf32>, vector<48x144xf32>, vector<8x144xf32> -> vector<8x144xf32>
    %c0_3 = arith.constant 0 : index
    %c0_4 = arith.constant 0 : index
    %3 = vector.load %arg2[%c0_3, %c0_4] : memref<1x144xf32, #tpu.memory_space<vmem>>, vector<1x144xf32>
    %4 = vector.broadcast %3 : vector<1x144xf32> to vector<8x144xf32>
    %5 = arith.addf %2, %4 : vector<8x144xf32>
    %6 = vector.extract_strided_slice %5 {offsets = [0, 0], sizes = [8, 48], strides = [1, 1]} : vector<8x144xf32> to vector<8x48xf32>
    %7 = vector.extract_strided_slice %5 {offsets = [0, 48], sizes = [8, 48], strides = [1, 1]} : vector<8x144xf32> to vector<8x48xf32>
    %8 = vector.extract_strided_slice %5 {offsets = [0, 96], sizes = [8, 48], strides = [1, 1]} : vector<8x144xf32> to vector<8x48xf32>
    %c0_5 = arith.constant 0 : index
    %c0_6 = arith.constant 0 : index
    %9 = vector.load %arg7[%c0_5, %c0_6] : memref<6x48xf32, #tpu.memory_space<vmem>>, vector<1x48xf32>
    %c1 = arith.constant 1 : index
    %c0_7 = arith.constant 0 : index
    %10 = vector.load %arg7[%c1, %c0_7] : memref<6x48xf32, #tpu.memory_space<vmem>>, vector<1x48xf32>
    %c2 = arith.constant 2 : index
    %c0_8 = arith.constant 0 : index
    %11 = vector.load %arg7[%c2, %c0_8] : memref<6x48xf32, #tpu.memory_space<vmem>>, vector<1x48xf32>
    %c3 = arith.constant 3 : index
    %c0_9 = arith.constant 0 : index
    %12 = vector.load %arg7[%c3, %c0_9] : memref<6x48xf32, #tpu.memory_space<vmem>>, vector<1x48xf32>
    %c4 = arith.constant 4 : index
    %c0_10 = arith.constant 0 : index
    %13 = vector.load %arg7[%c4, %c0_10] : memref<6x48xf32, #tpu.memory_space<vmem>>, vector<1x48xf32>
    %c5 = arith.constant 5 : index
    %c0_11 = arith.constant 0 : index
    %14 = vector.load %arg7[%c5, %c0_11] : memref<6x48xf32, #tpu.memory_space<vmem>>, vector<1x48xf32>
    %cst_12 = arith.constant 0.000000e+00 : f32
    %15 = vector.broadcast %cst_12 : f32 to vector<8x48xf32>
    %16 = vector.extract_strided_slice %6 {offsets = [0, 0], sizes = [8, 4], strides = [1, 1]} : vector<8x48xf32> to vector<8x4xf32>
    %17 = vector.extract_strided_slice %7 {offsets = [0, 0], sizes = [8, 4], strides = [1, 1]} : vector<8x48xf32> to vector<8x4xf32>
    %18 = vector.extract_strided_slice %8 {offsets = [0, 0], sizes = [8, 4], strides = [1, 1]} : vector<8x48xf32> to vector<8x4xf32>
    %cst_13 = arith.constant dense<0.000000e+00> : vector<8x8xf32>
    %19 = tpu.matmul %16, %17, %cst_13 {dimension_numbers = #tpu.dot_dimension_numbers<[1], [1], [0], [0], [0, 0, 1, 0], [], []>} : vector<8x4xf32>, vector<8x4xf32>, vector<8x8xf32> -> vector<8x8xf32>
    %cst_14 = arith.constant dense<0xFF800000> : vector<8xf32>
    %20 = vector.multi_reduction <maximumf>, %19, %cst_14 [1] : vector<8x8xf32> to vector<8xf32>
    %21 = vector.shape_cast %20 : vector<8xf32> to vector<8x1xf32>
    %22 = vector.broadcast %21 : vector<8x1xf32> to vector<8x8xf32>
    %23 = arith.subf %19, %22 : vector<8x8xf32>
    %24 = math.exp %23 : vector<8x8xf32>
    %cst_15 = arith.constant dense<0.000000e+00> : vector<8xf32>
    %25 = vector.multi_reduction <add>, %24, %cst_15 [1] : vector<8x8xf32> to vector<8xf32>
    %26 = vector.shape_cast %25 : vector<8xf32> to vector<8x1xf32>
    %27 = tpu.reciprocal %26 : vector<8x1xf32> -> vector<8x1xf32>
    %28 = vector.broadcast %27 : vector<8x1xf32> to vector<8x8xf32>
    %29 = arith.mulf %24, %28 : vector<8x8xf32>
    %cst_16 = arith.constant dense<0.000000e+00> : vector<8x4xf32>
    %30 = tpu.matmul %29, %18, %cst_16 {dimension_numbers = #tpu.dot_dimension_numbers<[1], [0], [0], [1], [0, 0, 1, 1], [], []>} : vector<8x8xf32>, vector<8x4xf32>, vector<8x4xf32> -> vector<8x4xf32>
    %c0_17 = arith.constant 0 : index
    %c0_18 = arith.constant 0 : index
    %c0_19 = arith.constant 0 : index
    %31 = vector.load %arg3[%c0_17, %c0_18, %c0_19] : memref<12x4x48xf32, #tpu.memory_space<vmem>>, vector<1x4x48xf32>
    %32 = vector.shape_cast %31 : vector<1x4x48xf32> to vector<4x48xf32>
    %cst_20 = arith.constant dense<0.000000e+00> : vector<8x48xf32>
    %33 = tpu.matmul %30, %32, %cst_20 {dimension_numbers = #tpu.dot_dimension_numbers<[1], [0], [0], [1], [0, 0, 1, 1], [], []>} : vector<8x4xf32>, vector<4x48xf32>, vector<8x48xf32> -> vector<8x48xf32>
    %34 = arith.addf %15, %33 : vector<8x48xf32>
    %35 = vector.extract_strided_slice %6 {offsets = [0, 4], sizes = [8, 4], strides = [1, 1]} : vector<8x48xf32> to vector<8x4xf32>
    %36 = vector.extract_strided_slice %7 {offsets = [0, 4], sizes = [8, 4], strides = [1, 1]} : vector<8x48xf32> to vector<8x4xf32>
    %37 = vector.extract_strided_slice %8 {offsets = [0, 4], sizes = [8, 4], strides = [1, 1]} : vector<8x48xf32> to vector<8x4xf32>
    %cst_21 = arith.constant dense<0.000000e+00> : vector<8x8xf32>
    %38 = tpu.matmul %35, %36, %cst_21 {dimension_numbers = #tpu.dot_dimension_numbers<[1], [1], [0], [0], [0, 0, 1, 0], [], []>} : vector<8x4xf32>, vector<8x4xf32>, vector<8x8xf32> -> vector<8x8xf32>
    %cst_22 = arith.constant dense<0xFF800000> : vector<8xf32>
    %39 = vector.multi_reduction <maximumf>, %38, %cst_22 [1] : vector<8x8xf32> to vector<8xf32>
    %40 = vector.shape_cast %39 : vector<8xf32> to vector<8x1xf32>
    %41 = vector.broadcast %40 : vector<8x1xf32> to vector<8x8xf32>
    %42 = arith.subf %38, %41 : vector<8x8xf32>
    %43 = math.exp %42 : vector<8x8xf32>
    %cst_23 = arith.constant dense<0.000000e+00> : vector<8xf32>
    %44 = vector.multi_reduction <add>, %43, %cst_23 [1] : vector<8x8xf32> to vector<8xf32>
    %45 = vector.shape_cast %44 : vector<8xf32> to vector<8x1xf32>
    %46 = tpu.reciprocal %45 : vector<8x1xf32> -> vector<8x1xf32>
    %47 = vector.broadcast %46 : vector<8x1xf32> to vector<8x8xf32>
    %48 = arith.mulf %43, %47 : vector<8x8xf32>
    %cst_24 = arith.constant dense<0.000000e+00> : vector<8x4xf32>
    %49 = tpu.matmul %48, %37, %cst_24 {dimension_numbers = #tpu.dot_dimension_numbers<[1], [0], [0], [1], [0, 0, 1, 1], [], []>} : vector<8x8xf32>, vector<8x4xf32>, vector<8x4xf32> -> vector<8x4xf32>
    %c1_25 = arith.constant 1 : index
    %c0_26 = arith.constant 0 : index
    %c0_27 = arith.constant 0 : index
    %50 = vector.load %arg3[%c1_25, %c0_26, %c0_27] : memref<12x4x48xf32, #tpu.memory_space<vmem>>, vector<1x4x48xf32>
    %51 = vector.shape_cast %50 : vector<1x4x48xf32> to vector<4x48xf32>
    %cst_28 = arith.constant dense<0.000000e+00> : vector<8x48xf32>
    %52 = tpu.matmul %49, %51, %cst_28 {dimension_numbers = #tpu.dot_dimension_numbers<[1], [0], [0], [1], [0, 0, 1, 1], [], []>} : vector<8x4xf32>, vector<4x48xf32>, vector<8x48xf32> -> vector<8x48xf32>
    %53 = arith.addf %34, %52 : vector<8x48xf32>
    %54 = vector.extract_strided_slice %6 {offsets = [0, 8], sizes = [8, 4], strides = [1, 1]} : vector<8x48xf32> to vector<8x4xf32>
    %55 = vector.extract_strided_slice %7 {offsets = [0, 8], sizes = [8, 4], strides = [1, 1]} : vector<8x48xf32> to vector<8x4xf32>
    %56 = vector.extract_strided_slice %8 {offsets = [0, 8], sizes = [8, 4], strides = [1, 1]} : vector<8x48xf32> to vector<8x4xf32>
    %cst_29 = arith.constant dense<0.000000e+00> : vector<8x8xf32>
    %57 = tpu.matmul %54, %55, %cst_29 {dimension_numbers = #tpu.dot_dimension_numbers<[1], [1], [0], [0], [0, 0, 1, 0], [], []>} : vector<8x4xf32>, vector<8x4xf32>, vector<8x8xf32> -> vector<8x8xf32>
    %cst_30 = arith.constant dense<0xFF800000> : vector<8xf32>
    %58 = vector.multi_reduction <maximumf>, %57, %cst_30 [1] : vector<8x8xf32> to vector<8xf32>
    %59 = vector.shape_cast %58 : vector<8xf32> to vector<8x1xf32>
    %60 = vector.broadcast %59 : vector<8x1xf32> to vector<8x8xf32>
    %61 = arith.subf %57, %60 : vector<8x8xf32>
    %62 = math.exp %61 : vector<8x8xf32>
    %cst_31 = arith.constant dense<0.000000e+00> : vector<8xf32>
    %63 = vector.multi_reduction <add>, %62, %cst_31 [1] : vector<8x8xf32> to vector<8xf32>
    %64 = vector.shape_cast %63 : vector<8xf32> to vector<8x1xf32>
    %65 = tpu.reciprocal %64 : vector<8x1xf32> -> vector<8x1xf32>
    %66 = vector.broadcast %65 : vector<8x1xf32> to vector<8x8xf32>
    %67 = arith.mulf %62, %66 : vector<8x8xf32>
    %cst_32 = arith.constant dense<0.000000e+00> : vector<8x4xf32>
    %68 = tpu.matmul %67, %56, %cst_32 {dimension_numbers = #tpu.dot_dimension_numbers<[1], [0], [0], [1], [0, 0, 1, 1], [], []>} : vector<8x8xf32>, vector<8x4xf32>, vector<8x4xf32> -> vector<8x4xf32>
    %c2_33 = arith.constant 2 : index
    %c0_34 = arith.constant 0 : index
    %c0_35 = arith.constant 0 : index
    %69 = vector.load %arg3[%c2_33, %c0_34, %c0_35] : memref<12x4x48xf32, #tpu.memory_space<vmem>>, vector<1x4x48xf32>
    %70 = vector.shape_cast %69 : vector<1x4x48xf32> to vector<4x48xf32>
    %cst_36 = arith.constant dense<0.000000e+00> : vector<8x48xf32>
    %71 = tpu.matmul %68, %70, %cst_36 {dimension_numbers = #tpu.dot_dimension_numbers<[1], [0], [0], [1], [0, 0, 1, 1], [], []>} : vector<8x4xf32>, vector<4x48xf32>, vector<8x48xf32> -> vector<8x48xf32>
    %72 = arith.addf %53, %71 : vector<8x48xf32>
    %73 = vector.extract_strided_slice %6 {offsets = [0, 12], sizes = [8, 4], strides = [1, 1]} : vector<8x48xf32> to vector<8x4xf32>
    %74 = vector.extract_strided_slice %7 {offsets = [0, 12], sizes = [8, 4], strides = [1, 1]} : vector<8x48xf32> to vector<8x4xf32>
    %75 = vector.extract_strided_slice %8 {offsets = [0, 12], sizes = [8, 4], strides = [1, 1]} : vector<8x48xf32> to vector<8x4xf32>
    %cst_37 = arith.constant dense<0.000000e+00> : vector<8x8xf32>
    %76 = tpu.matmul %73, %74, %cst_37 {dimension_numbers = #tpu.dot_dimension_numbers<[1], [1], [0], [0], [0, 0, 1, 0], [], []>} : vector<8x4xf32>, vector<8x4xf32>, vector<8x8xf32> -> vector<8x8xf32>
    %cst_38 = arith.constant dense<0xFF800000> : vector<8xf32>
    %77 = vector.multi_reduction <maximumf>, %76, %cst_38 [1] : vector<8x8xf32> to vector<8xf32>
    %78 = vector.shape_cast %77 : vector<8xf32> to vector<8x1xf32>
    %79 = vector.broadcast %78 : vector<8x1xf32> to vector<8x8xf32>
    %80 = arith.subf %76, %79 : vector<8x8xf32>
    %81 = math.exp %80 : vector<8x8xf32>
    %cst_39 = arith.constant dense<0.000000e+00> : vector<8xf32>
    %82 = vector.multi_reduction <add>, %81, %cst_39 [1] : vector<8x8xf32> to vector<8xf32>
    %83 = vector.shape_cast %82 : vector<8xf32> to vector<8x1xf32>
    %84 = tpu.reciprocal %83 : vector<8x1xf32> -> vector<8x1xf32>
    %85 = vector.broadcast %84 : vector<8x1xf32> to vector<8x8xf32>
    %86 = arith.mulf %81, %85 : vector<8x8xf32>
    %cst_40 = arith.constant dense<0.000000e+00> : vector<8x4xf32>
    %87 = tpu.matmul %86, %75, %cst_40 {dimension_numbers = #tpu.dot_dimension_numbers<[1], [0], [0], [1], [0, 0, 1, 1], [], []>} : vector<8x8xf32>, vector<8x4xf32>, vector<8x4xf32> -> vector<8x4xf32>
    %c3_41 = arith.constant 3 : index
    %c0_42 = arith.constant 0 : index
    %c0_43 = arith.constant 0 : index
    %88 = vector.load %arg3[%c3_41, %c0_42, %c0_43] : memref<12x4x48xf32, #tpu.memory_space<vmem>>, vector<1x4x48xf32>
    %89 = vector.shape_cast %88 : vector<1x4x48xf32> to vector<4x48xf32>
    %cst_44 = arith.constant dense<0.000000e+00> : vector<8x48xf32>
    %90 = tpu.matmul %87, %89, %cst_44 {dimension_numbers = #tpu.dot_dimension_numbers<[1], [0], [0], [1], [0, 0, 1, 1], [], []>} : vector<8x4xf32>, vector<4x48xf32>, vector<8x48xf32> -> vector<8x48xf32>
    %91 = arith.addf %72, %90 : vector<8x48xf32>
    %92 = vector.extract_strided_slice %6 {offsets = [0, 16], sizes = [8, 4], strides = [1, 1]} : vector<8x48xf32> to vector<8x4xf32>
    %93 = vector.extract_strided_slice %7 {offsets = [0, 16], sizes = [8, 4], strides = [1, 1]} : vector<8x48xf32> to vector<8x4xf32>
    %94 = vector.extract_strided_slice %8 {offsets = [0, 16], sizes = [8, 4], strides = [1, 1]} : vector<8x48xf32> to vector<8x4xf32>
    %cst_45 = arith.constant dense<0.000000e+00> : vector<8x8xf32>
    %95 = tpu.matmul %92, %93, %cst_45 {dimension_numbers = #tpu.dot_dimension_numbers<[1], [1], [0], [0], [0, 0, 1, 0], [], []>} : vector<8x4xf32>, vector<8x4xf32>, vector<8x8xf32> -> vector<8x8xf32>
    %cst_46 = arith.constant dense<0xFF800000> : vector<8xf32>
    %96 = vector.multi_reduction <maximumf>, %95, %cst_46 [1] : vector<8x8xf32> to vector<8xf32>
    %97 = vector.shape_cast %96 : vector<8xf32> to vector<8x1xf32>
    %98 = vector.broadcast %97 : vector<8x1xf32> to vector<8x8xf32>
    %99 = arith.subf %95, %98 : vector<8x8xf32>
    %100 = math.exp %99 : vector<8x8xf32>
    %cst_47 = arith.constant dense<0.000000e+00> : vector<8xf32>
    %101 = vector.multi_reduction <add>, %100, %cst_47 [1] : vector<8x8xf32> to vector<8xf32>
    %102 = vector.shape_cast %101 : vector<8xf32> to vector<8x1xf32>
    %103 = tpu.reciprocal %102 : vector<8x1xf32> -> vector<8x1xf32>
    %104 = vector.broadcast %103 : vector<8x1xf32> to vector<8x8xf32>
    %105 = arith.mulf %100, %104 : vector<8x8xf32>
    %cst_48 = arith.constant dense<0.000000e+00> : vector<8x4xf32>
    %106 = tpu.matmul %105, %94, %cst_48 {dimension_numbers = #tpu.dot_dimension_numbers<[1], [0], [0], [1], [0, 0, 1, 1], [], []>} : vector<8x8xf32>, vector<8x4xf32>, vector<8x4xf32> -> vector<8x4xf32>
    %c4_49 = arith.constant 4 : index
    %c0_50 = arith.constant 0 : index
    %c0_51 = arith.constant 0 : index
    %107 = vector.load %arg3[%c4_49, %c0_50, %c0_51] : memref<12x4x48xf32, #tpu.memory_space<vmem>>, vector<1x4x48xf32>
    %108 = vector.shape_cast %107 : vector<1x4x48xf32> to vector<4x48xf32>
    %cst_52 = arith.constant dense<0.000000e+00> : vector<8x48xf32>
    %109 = tpu.matmul %106, %108, %cst_52 {dimension_numbers = #tpu.dot_dimension_numbers<[1], [0], [0], [1], [0, 0, 1, 1], [], []>} : vector<8x4xf32>, vector<4x48xf32>, vector<8x48xf32> -> vector<8x48xf32>
    %110 = arith.addf %91, %109 : vector<8x48xf32>
    %111 = vector.extract_strided_slice %6 {offsets = [0, 20], sizes = [8, 4], strides = [1, 1]} : vector<8x48xf32> to vector<8x4xf32>
    %112 = vector.extract_strided_slice %7 {offsets = [0, 20], sizes = [8, 4], strides = [1, 1]} : vector<8x48xf32> to vector<8x4xf32>
    %113 = vector.extract_strided_slice %8 {offsets = [0, 20], sizes = [8, 4], strides = [1, 1]} : vector<8x48xf32> to vector<8x4xf32>
    %cst_53 = arith.constant dense<0.000000e+00> : vector<8x8xf32>
    %114 = tpu.matmul %111, %112, %cst_53 {dimension_numbers = #tpu.dot_dimension_numbers<[1], [1], [0], [0], [0, 0, 1, 0], [], []>} : vector<8x4xf32>, vector<8x4xf32>, vector<8x8xf32> -> vector<8x8xf32>
    %cst_54 = arith.constant dense<0xFF800000> : vector<8xf32>
    %115 = vector.multi_reduction <maximumf>, %114, %cst_54 [1] : vector<8x8xf32> to vector<8xf32>
    %116 = vector.shape_cast %115 : vector<8xf32> to vector<8x1xf32>
    %117 = vector.broadcast %116 : vector<8x1xf32> to vector<8x8xf32>
    %118 = arith.subf %114, %117 : vector<8x8xf32>
    %119 = math.exp %118 : vector<8x8xf32>
    %cst_55 = arith.constant dense<0.000000e+00> : vector<8xf32>
    %120 = vector.multi_reduction <add>, %119, %cst_55 [1] : vector<8x8xf32> to vector<8xf32>
    %121 = vector.shape_cast %120 : vector<8xf32> to vector<8x1xf32>
    %122 = tpu.reciprocal %121 : vector<8x1xf32> -> vector<8x1xf32>
    %123 = vector.broadcast %122 : vector<8x1xf32> to vector<8x8xf32>
    %124 = arith.mulf %119, %123 : vector<8x8xf32>
    %cst_56 = arith.constant dense<0.000000e+00> : vector<8x4xf32>
    %125 = tpu.matmul %124, %113, %cst_56 {dimension_numbers = #tpu.dot_dimension_numbers<[1], [0], [0], [1], [0, 0, 1, 1], [], []>} : vector<8x8xf32>, vector<8x4xf32>, vector<8x4xf32> -> vector<8x4xf32>
    %c5_57 = arith.constant 5 : index
    %c0_58 = arith.constant 0 : index
    %c0_59 = arith.constant 0 : index
    %126 = vector.load %arg3[%c5_57, %c0_58, %c0_59] : memref<12x4x48xf32, #tpu.memory_space<vmem>>, vector<1x4x48xf32>
    %127 = vector.shape_cast %126 : vector<1x4x48xf32> to vector<4x48xf32>
    %cst_60 = arith.constant dense<0.000000e+00> : vector<8x48xf32>
    %128 = tpu.matmul %125, %127, %cst_60 {dimension_numbers = #tpu.dot_dimension_numbers<[1], [0], [0], [1], [0, 0, 1, 1], [], []>} : vector<8x4xf32>, vector<4x48xf32>, vector<8x48xf32> -> vector<8x48xf32>
    %129 = arith.addf %110, %128 : vector<8x48xf32>
    %130 = vector.extract_strided_slice %6 {offsets = [0, 24], sizes = [8, 4], strides = [1, 1]} : vector<8x48xf32> to vector<8x4xf32>
    %131 = vector.extract_strided_slice %7 {offsets = [0, 24], sizes = [8, 4], strides = [1, 1]} : vector<8x48xf32> to vector<8x4xf32>
    %132 = vector.extract_strided_slice %8 {offsets = [0, 24], sizes = [8, 4], strides = [1, 1]} : vector<8x48xf32> to vector<8x4xf32>
    %cst_61 = arith.constant dense<0.000000e+00> : vector<8x8xf32>
    %133 = tpu.matmul %130, %131, %cst_61 {dimension_numbers = #tpu.dot_dimension_numbers<[1], [1], [0], [0], [0, 0, 1, 0], [], []>} : vector<8x4xf32>, vector<8x4xf32>, vector<8x8xf32> -> vector<8x8xf32>
    %cst_62 = arith.constant dense<0xFF800000> : vector<8xf32>
    %134 = vector.multi_reduction <maximumf>, %133, %cst_62 [1] : vector<8x8xf32> to vector<8xf32>
    %135 = vector.shape_cast %134 : vector<8xf32> to vector<8x1xf32>
    %136 = vector.broadcast %135 : vector<8x1xf32> to vector<8x8xf32>
    %137 = arith.subf %133, %136 : vector<8x8xf32>
    %138 = math.exp %137 : vector<8x8xf32>
    %cst_63 = arith.constant dense<0.000000e+00> : vector<8xf32>
    %139 = vector.multi_reduction <add>, %138, %cst_63 [1] : vector<8x8xf32> to vector<8xf32>
    %140 = vector.shape_cast %139 : vector<8xf32> to vector<8x1xf32>
    %141 = tpu.reciprocal %140 : vector<8x1xf32> -> vector<8x1xf32>
    %142 = vector.broadcast %141 : vector<8x1xf32> to vector<8x8xf32>
    %143 = arith.mulf %138, %142 : vector<8x8xf32>
    %cst_64 = arith.constant dense<0.000000e+00> : vector<8x4xf32>
    %144 = tpu.matmul %143, %132, %cst_64 {dimension_numbers = #tpu.dot_dimension_numbers<[1], [0], [0], [1], [0, 0, 1, 1], [], []>} : vector<8x8xf32>, vector<8x4xf32>, vector<8x4xf32> -> vector<8x4xf32>
    %c6 = arith.constant 6 : index
    %c0_65 = arith.constant 0 : index
    %c0_66 = arith.constant 0 : index
    %145 = vector.load %arg3[%c6, %c0_65, %c0_66] : memref<12x4x48xf32, #tpu.memory_space<vmem>>, vector<1x4x48xf32>
    %146 = vector.shape_cast %145 : vector<1x4x48xf32> to vector<4x48xf32>
    %cst_67 = arith.constant dense<0.000000e+00> : vector<8x48xf32>
    %147 = tpu.matmul %144, %146, %cst_67 {dimension_numbers = #tpu.dot_dimension_numbers<[1], [0], [0], [1], [0, 0, 1, 1], [], []>} : vector<8x4xf32>, vector<4x48xf32>, vector<8x48xf32> -> vector<8x48xf32>
    %148 = arith.addf %129, %147 : vector<8x48xf32>
    %149 = vector.extract_strided_slice %6 {offsets = [0, 28], sizes = [8, 4], strides = [1, 1]} : vector<8x48xf32> to vector<8x4xf32>
    %150 = vector.extract_strided_slice %7 {offsets = [0, 28], sizes = [8, 4], strides = [1, 1]} : vector<8x48xf32> to vector<8x4xf32>
    %151 = vector.extract_strided_slice %8 {offsets = [0, 28], sizes = [8, 4], strides = [1, 1]} : vector<8x48xf32> to vector<8x4xf32>
    %cst_68 = arith.constant dense<0.000000e+00> : vector<8x8xf32>
    %152 = tpu.matmul %149, %150, %cst_68 {dimension_numbers = #tpu.dot_dimension_numbers<[1], [1], [0], [0], [0, 0, 1, 0], [], []>} : vector<8x4xf32>, vector<8x4xf32>, vector<8x8xf32> -> vector<8x8xf32>
    %cst_69 = arith.constant dense<0xFF800000> : vector<8xf32>
    %153 = vector.multi_reduction <maximumf>, %152, %cst_69 [1] : vector<8x8xf32> to vector<8xf32>
    %154 = vector.shape_cast %153 : vector<8xf32> to vector<8x1xf32>
    %155 = vector.broadcast %154 : vector<8x1xf32> to vector<8x8xf32>
    %156 = arith.subf %152, %155 : vector<8x8xf32>
    %157 = math.exp %156 : vector<8x8xf32>
    %cst_70 = arith.constant dense<0.000000e+00> : vector<8xf32>
    %158 = vector.multi_reduction <add>, %157, %cst_70 [1] : vector<8x8xf32> to vector<8xf32>
    %159 = vector.shape_cast %158 : vector<8xf32> to vector<8x1xf32>
    %160 = tpu.reciprocal %159 : vector<8x1xf32> -> vector<8x1xf32>
    %161 = vector.broadcast %160 : vector<8x1xf32> to vector<8x8xf32>
    %162 = arith.mulf %157, %161 : vector<8x8xf32>
    %cst_71 = arith.constant dense<0.000000e+00> : vector<8x4xf32>
    %163 = tpu.matmul %162, %151, %cst_71 {dimension_numbers = #tpu.dot_dimension_numbers<[1], [0], [0], [1], [0, 0, 1, 1], [], []>} : vector<8x8xf32>, vector<8x4xf32>, vector<8x4xf32> -> vector<8x4xf32>
    %c7 = arith.constant 7 : index
    %c0_72 = arith.constant 0 : index
    %c0_73 = arith.constant 0 : index
    %164 = vector.load %arg3[%c7, %c0_72, %c0_73] : memref<12x4x48xf32, #tpu.memory_space<vmem>>, vector<1x4x48xf32>
    %165 = vector.shape_cast %164 : vector<1x4x48xf32> to vector<4x48xf32>
    %cst_74 = arith.constant dense<0.000000e+00> : vector<8x48xf32>
    %166 = tpu.matmul %163, %165, %cst_74 {dimension_numbers = #tpu.dot_dimension_numbers<[1], [0], [0], [1], [0, 0, 1, 1], [], []>} : vector<8x4xf32>, vector<4x48xf32>, vector<8x48xf32> -> vector<8x48xf32>
    %167 = arith.addf %148, %166 : vector<8x48xf32>
    %168 = vector.extract_strided_slice %6 {offsets = [0, 32], sizes = [8, 4], strides = [1, 1]} : vector<8x48xf32> to vector<8x4xf32>
    %169 = vector.extract_strided_slice %7 {offsets = [0, 32], sizes = [8, 4], strides = [1, 1]} : vector<8x48xf32> to vector<8x4xf32>
    %170 = vector.extract_strided_slice %8 {offsets = [0, 32], sizes = [8, 4], strides = [1, 1]} : vector<8x48xf32> to vector<8x4xf32>
    %cst_75 = arith.constant dense<0.000000e+00> : vector<8x8xf32>
    %171 = tpu.matmul %168, %169, %cst_75 {dimension_numbers = #tpu.dot_dimension_numbers<[1], [1], [0], [0], [0, 0, 1, 0], [], []>} : vector<8x4xf32>, vector<8x4xf32>, vector<8x8xf32> -> vector<8x8xf32>
    %cst_76 = arith.constant dense<0xFF800000> : vector<8xf32>
    %172 = vector.multi_reduction <maximumf>, %171, %cst_76 [1] : vector<8x8xf32> to vector<8xf32>
    %173 = vector.shape_cast %172 : vector<8xf32> to vector<8x1xf32>
    %174 = vector.broadcast %173 : vector<8x1xf32> to vector<8x8xf32>
    %175 = arith.subf %171, %174 : vector<8x8xf32>
    %176 = math.exp %175 : vector<8x8xf32>
    %cst_77 = arith.constant dense<0.000000e+00> : vector<8xf32>
    %177 = vector.multi_reduction <add>, %176, %cst_77 [1] : vector<8x8xf32> to vector<8xf32>
    %178 = vector.shape_cast %177 : vector<8xf32> to vector<8x1xf32>
    %179 = tpu.reciprocal %178 : vector<8x1xf32> -> vector<8x1xf32>
    %180 = vector.broadcast %179 : vector<8x1xf32> to vector<8x8xf32>
    %181 = arith.mulf %176, %180 : vector<8x8xf32>
    %cst_78 = arith.constant dense<0.000000e+00> : vector<8x4xf32>
    %182 = tpu.matmul %181, %170, %cst_78 {dimension_numbers = #tpu.dot_dimension_numbers<[1], [0], [0], [1], [0, 0, 1, 1], [], []>} : vector<8x8xf32>, vector<8x4xf32>, vector<8x4xf32> -> vector<8x4xf32>
    %c8 = arith.constant 8 : index
    %c0_79 = arith.constant 0 : index
    %c0_80 = arith.constant 0 : index
    %183 = vector.load %arg3[%c8, %c0_79, %c0_80] : memref<12x4x48xf32, #tpu.memory_space<vmem>>, vector<1x4x48xf32>
    %184 = vector.shape_cast %183 : vector<1x4x48xf32> to vector<4x48xf32>
    %cst_81 = arith.constant dense<0.000000e+00> : vector<8x48xf32>
    %185 = tpu.matmul %182, %184, %cst_81 {dimension_numbers = #tpu.dot_dimension_numbers<[1], [0], [0], [1], [0, 0, 1, 1], [], []>} : vector<8x4xf32>, vector<4x48xf32>, vector<8x48xf32> -> vector<8x48xf32>
    %186 = arith.addf %167, %185 : vector<8x48xf32>
    %187 = vector.extract_strided_slice %6 {offsets = [0, 36], sizes = [8, 4], strides = [1, 1]} : vector<8x48xf32> to vector<8x4xf32>
    %188 = vector.extract_strided_slice %7 {offsets = [0, 36], sizes = [8, 4], strides = [1, 1]} : vector<8x48xf32> to vector<8x4xf32>
    %189 = vector.extract_strided_slice %8 {offsets = [0, 36], sizes = [8, 4], strides = [1, 1]} : vector<8x48xf32> to vector<8x4xf32>
    %cst_82 = arith.constant dense<0.000000e+00> : vector<8x8xf32>
    %190 = tpu.matmul %187, %188, %cst_82 {dimension_numbers = #tpu.dot_dimension_numbers<[1], [1], [0], [0], [0, 0, 1, 0], [], []>} : vector<8x4xf32>, vector<8x4xf32>, vector<8x8xf32> -> vector<8x8xf32>
    %cst_83 = arith.constant dense<0xFF800000> : vector<8xf32>
    %191 = vector.multi_reduction <maximumf>, %190, %cst_83 [1] : vector<8x8xf32> to vector<8xf32>
    %192 = vector.shape_cast %191 : vector<8xf32> to vector<8x1xf32>
    %193 = vector.broadcast %192 : vector<8x1xf32> to vector<8x8xf32>
    %194 = arith.subf %190, %193 : vector<8x8xf32>
    %195 = math.exp %194 : vector<8x8xf32>
    %cst_84 = arith.constant dense<0.000000e+00> : vector<8xf32>
    %196 = vector.multi_reduction <add>, %195, %cst_84 [1] : vector<8x8xf32> to vector<8xf32>
    %197 = vector.shape_cast %196 : vector<8xf32> to vector<8x1xf32>
    %198 = tpu.reciprocal %197 : vector<8x1xf32> -> vector<8x1xf32>
    %199 = vector.broadcast %198 : vector<8x1xf32> to vector<8x8xf32>
    %200 = arith.mulf %195, %199 : vector<8x8xf32>
    %cst_85 = arith.constant dense<0.000000e+00> : vector<8x4xf32>
    %201 = tpu.matmul %200, %189, %cst_85 {dimension_numbers = #tpu.dot_dimension_numbers<[1], [0], [0], [1], [0, 0, 1, 1], [], []>} : vector<8x8xf32>, vector<8x4xf32>, vector<8x4xf32> -> vector<8x4xf32>
    %c9 = arith.constant 9 : index
    %c0_86 = arith.constant 0 : index
    %c0_87 = arith.constant 0 : index
    %202 = vector.load %arg3[%c9, %c0_86, %c0_87] : memref<12x4x48xf32, #tpu.memory_space<vmem>>, vector<1x4x48xf32>
    %203 = vector.shape_cast %202 : vector<1x4x48xf32> to vector<4x48xf32>
    %cst_88 = arith.constant dense<0.000000e+00> : vector<8x48xf32>
    %204 = tpu.matmul %201, %203, %cst_88 {dimension_numbers = #tpu.dot_dimension_numbers<[1], [0], [0], [1], [0, 0, 1, 1], [], []>} : vector<8x4xf32>, vector<4x48xf32>, vector<8x48xf32> -> vector<8x48xf32>
    %205 = arith.addf %186, %204 : vector<8x48xf32>
    %206 = vector.extract_strided_slice %6 {offsets = [0, 40], sizes = [8, 4], strides = [1, 1]} : vector<8x48xf32> to vector<8x4xf32>
    %207 = vector.extract_strided_slice %7 {offsets = [0, 40], sizes = [8, 4], strides = [1, 1]} : vector<8x48xf32> to vector<8x4xf32>
    %208 = vector.extract_strided_slice %8 {offsets = [0, 40], sizes = [8, 4], strides = [1, 1]} : vector<8x48xf32> to vector<8x4xf32>
    %cst_89 = arith.constant dense<0.000000e+00> : vector<8x8xf32>
    %209 = tpu.matmul %206, %207, %cst_89 {dimension_numbers = #tpu.dot_dimension_numbers<[1], [1], [0], [0], [0, 0, 1, 0], [], []>} : vector<8x4xf32>, vector<8x4xf32>, vector<8x8xf32> -> vector<8x8xf32>
    %cst_90 = arith.constant dense<0xFF800000> : vector<8xf32>
    %210 = vector.multi_reduction <maximumf>, %209, %cst_90 [1] : vector<8x8xf32> to vector<8xf32>
    %211 = vector.shape_cast %210 : vector<8xf32> to vector<8x1xf32>
    %212 = vector.broadcast %211 : vector<8x1xf32> to vector<8x8xf32>
    %213 = arith.subf %209, %212 : vector<8x8xf32>
    %214 = math.exp %213 : vector<8x8xf32>
    %cst_91 = arith.constant dense<0.000000e+00> : vector<8xf32>
    %215 = vector.multi_reduction <add>, %214, %cst_91 [1] : vector<8x8xf32> to vector<8xf32>
    %216 = vector.shape_cast %215 : vector<8xf32> to vector<8x1xf32>
    %217 = tpu.reciprocal %216 : vector<8x1xf32> -> vector<8x1xf32>
    %218 = vector.broadcast %217 : vector<8x1xf32> to vector<8x8xf32>
    %219 = arith.mulf %214, %218 : vector<8x8xf32>
    %cst_92 = arith.constant dense<0.000000e+00> : vector<8x4xf32>
    %220 = tpu.matmul %219, %208, %cst_92 {dimension_numbers = #tpu.dot_dimension_numbers<[1], [0], [0], [1], [0, 0, 1, 1], [], []>} : vector<8x8xf32>, vector<8x4xf32>, vector<8x4xf32> -> vector<8x4xf32>
    %c10 = arith.constant 10 : index
    %c0_93 = arith.constant 0 : index
    %c0_94 = arith.constant 0 : index
    %221 = vector.load %arg3[%c10, %c0_93, %c0_94] : memref<12x4x48xf32, #tpu.memory_space<vmem>>, vector<1x4x48xf32>
    %222 = vector.shape_cast %221 : vector<1x4x48xf32> to vector<4x48xf32>
    %cst_95 = arith.constant dense<0.000000e+00> : vector<8x48xf32>
    %223 = tpu.matmul %220, %222, %cst_95 {dimension_numbers = #tpu.dot_dimension_numbers<[1], [0], [0], [1], [0, 0, 1, 1], [], []>} : vector<8x4xf32>, vector<4x48xf32>, vector<8x48xf32> -> vector<8x48xf32>
    %224 = arith.addf %205, %223 : vector<8x48xf32>
    %225 = vector.extract_strided_slice %6 {offsets = [0, 44], sizes = [8, 4], strides = [1, 1]} : vector<8x48xf32> to vector<8x4xf32>
    %226 = vector.extract_strided_slice %7 {offsets = [0, 44], sizes = [8, 4], strides = [1, 1]} : vector<8x48xf32> to vector<8x4xf32>
    %227 = vector.extract_strided_slice %8 {offsets = [0, 44], sizes = [8, 4], strides = [1, 1]} : vector<8x48xf32> to vector<8x4xf32>
    %cst_96 = arith.constant dense<0.000000e+00> : vector<8x8xf32>
    %228 = tpu.matmul %225, %226, %cst_96 {dimension_numbers = #tpu.dot_dimension_numbers<[1], [1], [0], [0], [0, 0, 1, 0], [], []>} : vector<8x4xf32>, vector<8x4xf32>, vector<8x8xf32> -> vector<8x8xf32>
    %cst_97 = arith.constant dense<0xFF800000> : vector<8xf32>
    %229 = vector.multi_reduction <maximumf>, %228, %cst_97 [1] : vector<8x8xf32> to vector<8xf32>
    %230 = vector.shape_cast %229 : vector<8xf32> to vector<8x1xf32>
    %231 = vector.broadcast %230 : vector<8x1xf32> to vector<8x8xf32>
    %232 = arith.subf %228, %231 : vector<8x8xf32>
    %233 = math.exp %232 : vector<8x8xf32>
    %cst_98 = arith.constant dense<0.000000e+00> : vector<8xf32>
    %234 = vector.multi_reduction <add>, %233, %cst_98 [1] : vector<8x8xf32> to vector<8xf32>
    %235 = vector.shape_cast %234 : vector<8xf32> to vector<8x1xf32>
    %236 = tpu.reciprocal %235 : vector<8x1xf32> -> vector<8x1xf32>
    %237 = vector.broadcast %236 : vector<8x1xf32> to vector<8x8xf32>
    %238 = arith.mulf %233, %237 : vector<8x8xf32>
    %cst_99 = arith.constant dense<0.000000e+00> : vector<8x4xf32>
    %239 = tpu.matmul %238, %227, %cst_99 {dimension_numbers = #tpu.dot_dimension_numbers<[1], [0], [0], [1], [0, 0, 1, 1], [], []>} : vector<8x8xf32>, vector<8x4xf32>, vector<8x4xf32> -> vector<8x4xf32>
    %c11 = arith.constant 11 : index
    %c0_100 = arith.constant 0 : index
    %c0_101 = arith.constant 0 : index
    %240 = vector.load %arg3[%c11, %c0_100, %c0_101] : memref<12x4x48xf32, #tpu.memory_space<vmem>>, vector<1x4x48xf32>
    %241 = vector.shape_cast %240 : vector<1x4x48xf32> to vector<4x48xf32>
    %cst_102 = arith.constant dense<0.000000e+00> : vector<8x48xf32>
    %242 = tpu.matmul %239, %241, %cst_102 {dimension_numbers = #tpu.dot_dimension_numbers<[1], [0], [0], [1], [0, 0, 1, 1], [], []>} : vector<8x4xf32>, vector<4x48xf32>, vector<8x48xf32> -> vector<8x48xf32>
    %243 = arith.addf %224, %242 : vector<8x48xf32>
    %244 = vector.broadcast %9 : vector<1x48xf32> to vector<8x48xf32>
    %245 = arith.addf %243, %244 : vector<8x48xf32>
    %246 = arith.addf %245, %0 : vector<8x48xf32>
    %cst_103 = arith.constant dense<0.000000e+00> : vector<8xf32>
    %247 = vector.multi_reduction <add>, %246, %cst_103 [1] : vector<8x48xf32> to vector<8xf32>
    %248 = vector.shape_cast %247 : vector<8xf32> to vector<8x1xf32>
    %cst_104 = arith.constant 4.800000e+01 : f32
    %249 = vector.broadcast %cst_104 : f32 to vector<8x1xf32>
    %250 = arith.divf %248, %249 : vector<8x1xf32>
    %251 = vector.broadcast %250 : vector<8x1xf32> to vector<8x48xf32>
    %252 = arith.subf %246, %251 : vector<8x48xf32>
    %253 = arith.mulf %252, %252 : vector<8x48xf32>
    %cst_105 = arith.constant dense<0.000000e+00> : vector<8xf32>
    %254 = vector.multi_reduction <add>, %253, %cst_105 [1] : vector<8x48xf32> to vector<8xf32>
    %255 = vector.shape_cast %254 : vector<8xf32> to vector<8x1xf32>
    %cst_106 = arith.constant 4.800000e+01 : f32
    %256 = vector.broadcast %cst_106 : f32 to vector<8x1xf32>
    %257 = arith.divf %255, %256 : vector<8x1xf32>
    %258 = vector.broadcast %250 : vector<8x1xf32> to vector<8x48xf32>
    %259 = arith.subf %246, %258 : vector<8x48xf32>
    %cst_107 = arith.constant 9.99999974E-6 : f32
    %260 = vector.broadcast %cst_107 : f32 to vector<8x1xf32>
    %261 = arith.addf %257, %260 : vector<8x1xf32>
    %262 = math.rsqrt %261 : vector<8x1xf32>
    %263 = vector.broadcast %262 : vector<8x1xf32> to vector<8x48xf32>
    %264 = arith.mulf %259, %263 : vector<8x48xf32>
    %265 = vector.broadcast %10 : vector<1x48xf32> to vector<8x48xf32>
    %266 = arith.mulf %264, %265 : vector<8x48xf32>
    %267 = vector.broadcast %11 : vector<1x48xf32> to vector<8x48xf32>
    %268 = arith.addf %266, %267 : vector<8x48xf32>
    %c0_108 = arith.constant 0 : index
    %c0_109 = arith.constant 0 : index
    %269 = vector.load %arg4[%c0_108, %c0_109] : memref<48x50xf32, #tpu.memory_space<vmem>>, vector<48x50xf32>
    %cst_110 = arith.constant dense<0.000000e+00> : vector<8x50xf32>
    %270 = tpu.matmul %268, %269, %cst_110 {dimension_numbers = #tpu.dot_dimension_numbers<[1], [0], [0], [1], [0, 0, 1, 1], [], []>} : vector<8x48xf32>, vector<48x50xf32>, vector<8x50xf32> -> vector<8x50xf32>
    %c0_111 = arith.constant 0 : index
    %c0_112 = arith.constant 0 : index
    %271 = vector.load %arg5[%c0_111, %c0_112] : memref<1x50xf32, #tpu.memory_space<vmem>>, vector<1x50xf32>
    %272 = vector.broadcast %271 : vector<1x50xf32> to vector<8x50xf32>
    %273 = arith.addf %270, %272 : vector<8x50xf32>
    %cst_113 = arith.constant 0.000000e+00 : f32
    %274 = vector.broadcast %cst_113 : f32 to vector<8x50xf32>
    %275 = arith.maximumf %273, %274 : vector<8x50xf32>
    %c0_114 = arith.constant 0 : index
    %c0_115 = arith.constant 0 : index
    %276 = vector.load %arg6[%c0_114, %c0_115] : memref<50x48xf32, #tpu.memory_space<vmem>>, vector<50x48xf32>
    %cst_116 = arith.constant dense<0.000000e+00> : vector<8x48xf32>
    %277 = tpu.matmul %275, %276, %cst_116 {dimension_numbers = #tpu.dot_dimension_numbers<[1], [0], [0], [1], [0, 0, 1, 1], [], []>} : vector<8x50xf32>, vector<50x48xf32>, vector<8x48xf32> -> vector<8x48xf32>
    %278 = vector.broadcast %12 : vector<1x48xf32> to vector<8x48xf32>
    %279 = arith.addf %277, %278 : vector<8x48xf32>
    %280 = arith.addf %279, %268 : vector<8x48xf32>
    %cst_117 = arith.constant dense<0.000000e+00> : vector<8xf32>
    %281 = vector.multi_reduction <add>, %280, %cst_117 [1] : vector<8x48xf32> to vector<8xf32>
    %282 = vector.shape_cast %281 : vector<8xf32> to vector<8x1xf32>
    %cst_118 = arith.constant 4.800000e+01 : f32
    %283 = vector.broadcast %cst_118 : f32 to vector<8x1xf32>
    %284 = arith.divf %282, %283 : vector<8x1xf32>
    %285 = vector.broadcast %284 : vector<8x1xf32> to vector<8x48xf32>
    %286 = arith.subf %280, %285 : vector<8x48xf32>
    %287 = arith.mulf %286, %286 : vector<8x48xf32>
    %cst_119 = arith.constant dense<0.000000e+00> : vector<8xf32>
    %288 = vector.multi_reduction <add>, %287, %cst_119 [1] : vector<8x48xf32> to vector<8xf32>
    %289 = vector.shape_cast %288 : vector<8xf32> to vector<8x1xf32>
    %cst_120 = arith.constant 4.800000e+01 : f32
    %290 = vector.broadcast %cst_120 : f32 to vector<8x1xf32>
    %291 = arith.divf %289, %290 : vector<8x1xf32>
    %292 = vector.broadcast %284 : vector<8x1xf32> to vector<8x48xf32>
    %293 = arith.subf %280, %292 : vector<8x48xf32>
    %cst_121 = arith.constant 9.99999974E-6 : f32
    %294 = vector.broadcast %cst_121 : f32 to vector<8x1xf32>
    %295 = arith.addf %291, %294 : vector<8x1xf32>
    %296 = math.rsqrt %295 : vector<8x1xf32>
    %297 = vector.broadcast %296 : vector<8x1xf32> to vector<8x48xf32>
    %298 = arith.mulf %293, %297 : vector<8x48xf32>
    %299 = vector.broadcast %13 : vector<1x48xf32> to vector<8x48xf32>
    %300 = arith.mulf %298, %299 : vector<8x48xf32>
    %301 = vector.broadcast %14 : vector<1x48xf32> to vector<8x48xf32>
    %302 = arith.addf %300, %301 : vector<8x48xf32>
    %c0_122 = arith.constant 0 : index
    %c0_123 = arith.constant 0 : index
    %303 = vector.load %arg8[%c0_122, %c0_123] : memref<8x48xf32, #tpu.memory_space<vmem>>, vector<8x48xf32>
    tpu.vector_store %arg8[%c0_122, %c0_123], %302 {strides = array<i32>} : memref<8x48xf32, #tpu.memory_space<vmem>>, vector<8x48xf32>,
    return
  }
}

</mosaic_0001>

<bundles_post_ra>
// kernel: tpu_custom_call.1
= control target key start
LH: loop header
LB: loop body
LE: loop exit
PB: predicated region body
PF: predicated region fallthrough
CT: control target
= control target key end

     0   :  { %13 = vsyncpa [#allocation3], 0  ;;  %s4374_s0 = inlined_call_operand.vmem [shape: f32[8,48], index: 0, kind: input, shape index: {}]   ;;  %s4375_s1 = inlined_call_operand.vmem [shape: f32[48,144], index: 1, kind: input, shape index: {}]   ;;  %s4376_s2 = inlined_call_operand.vmem [shape: f32[1,144], index: 2, kind: input, shape index: {}]   ;;  %s4377_s3 = inlined_call_operand.hbm [shape: f32[12,4,48], index: 3, kind: input, shape index: {}]   ;;  %s4378_s4 = inlined_call_operand.hbm [shape: f32[48,50], index: 4, kind: input, shape index: {}]   ;;  %s4379_s5 = inlined_call_operand.vmem [shape: f32[1,50], index: 5, kind: input, shape index: {}]   ;;  %s4380_s6 = inlined_call_operand.vmem [shape: f32[50,48], index: 6, kind: input, shape index: {}]   ;;  %s4381_s7 = inlined_call_operand.vmem [shape: f32[6,48], index: 7, kind: input, shape index: {}]   ;;  %s4382_s8 = inlined_call_operand.hbm [shape: f32[8,48], index: 8, kind: output, shape index: {}]  }
   0x1   :  { %14 = vsyncpa [#allocation6], 0 }
   0x2   :  { %15 = vsyncpa [#allocation4], 0  ;;  %s3899_s27 = smov [#allocation2]   ;;  %s3827_s9 = scalar_lea.hbm %s4377_s3, 768 }
   0x3   :  { %s27_s28 = sshll.u32 %s3899_s27, 4  ;;  %p3828_p0 = scmp.ne.s32.totalorder %s4377_s3, %s3827_s9  ;;  %s28_s28 = int_to_ptr.vmem [resolvable:$true] %s27_s28 }
   0x4   :  { %p3831_p1 = scmp.lt.u32.totalorder %s3827_s9, %s4377_s3 }
   0x6   :  { %p3833_p2 = pnand %p3831_p1, %p3828_p0 }
   0x8   :  { %3836 = shalt.err (!%p3833_p2)
}
   0x9   :  { %s3837_s14 = scalar_lea.vmem %s28_s28, 768  ;;  %p3842_p4 = scmp.lt.s32.totalorder %s28_s28, %s28_s28 }
   0xa   :  { %p3838_p3 = scmp.ne.s32.totalorder %s28_s28, %s3837_s14  ;;  %p3843_p5 = scmp.lt.s32.totalorder %s3837_s14, %s3837_s14 }
   0xc   :  { %p3844_p6 = por %p3843_p5, %p3842_p4 }
   0xe   :  { %p3845_p7 = pnand %p3844_p6, %p3838_p3 }
  0x10   :  { %3848 = shalt.err (!%p3845_p7)
}
  0x11   :  { %s3900_s15 = smov 64   ;;  %s3901_s16 = smov 4  }
  0x12   :  { %33 = dma.hbm_to_vmem [thread:$0]  %s4377_s3, 768, %s28_s28, [#allocation3], %s3900_s15, %s3900_s15, %s3901_s16  }
  0x13   :  { %s3902_s19 = smov [#allocation5]   ;;  %s3849_s23 = scalar_lea.hbm %s4378_s4, 768 }
  0x14   :  { %s39_s20 = sshll.u32 %s3902_s19, 4  ;;  %p3850_p8 = scmp.ne.s32.totalorder %s4378_s4, %s3849_s23  ;;  %s40_s20 = int_to_ptr.vmem [resolvable:$true] %s39_s20 }
  0x15   :  { %p3853_p9 = scmp.lt.u32.totalorder %s3849_s23, %s4378_s4 }
  0x17   :  { %p3855_p10 = pnand %p3853_p9, %p3850_p8 }
  0x19   :  { %3858 = shalt.err (!%p3855_p10)
}
  0x1a   :  { %s3859_s29 = scalar_lea.vmem %s40_s20, 768  ;;  %p3864_p12 = scmp.lt.s32.totalorder %s40_s20, %s40_s20 }
  0x1b   :  { %p3860_p11 = scmp.ne.s32.totalorder %s40_s20, %s3859_s29  ;;  %p3865_p13 = scmp.lt.s32.totalorder %s3859_s29, %s3859_s29 }
  0x1d   :  { %p3866_p0 = por %p3865_p13, %p3864_p12 }
  0x1f   :  { %p3867_p1 = pnand %p3866_p0, %p3860_p11 }
  0x21   :  { %3870 = shalt.err (!%p3867_p1)
}
  0x22   :  { %s3903_s3 = smov 128   ;;  %s3904_s28 = smov 8  }
  0x23   :  { %45 = dma.hbm_to_vmem [thread:$0]  %s4378_s4, 768, %s40_s20, [#allocation6], %s3903_s3, %s3903_s3, %s3904_s28  }
  0x24   :  { %3893 = dma.done.wait [#allocation3], 768  }
  0x25   :  { %3894 = vsyncadd [#allocation3], 4294966528 }
  0x26   :  { %3895 = dma.done.wait [#allocation6], 768  }
  0x27   :  { %3896 = vsyncadd [#allocation6], 4294966528  ;;  %v3905_v0 = vmov 0.0   ;;  %v60_v1 = vld [vmem:[%s4375_s1 + $0x8] sm:$0xff]  ;;  %v62_v2 = vld [vmem:[%s4375_s1 + $0x18] sm:$0xff]  ;;  %vm83_vm0 = vcmask 392192   ;;  %v73_v20 = vlaneseq }
  0x28   :  { %151 = vmatprep.mubr.f32.mxu0 %v3905_v0  ;;  %3494 = vmatprep.subr.mxu1 %v3905_v0  ;;  %v59_v3 = vld [vmem:[%s4375_s1] sm:$0xff]  ;;  %v3706_v4 = vpack.c.bf16 %v62_v2, %v60_v1  ;;  %v61_v5 = vld [vmem:[%s4375_s1 + $0x10] sm:$0xff]  ;;  %v64_v6 = vld [vmem:[%s4375_s1 + $0x28] sm:$0xff]  ;;  %vm3906_vm1 = vmmov 0   ;;  %s3907_s4 = smov 32   ;;  %s3908_s18 = smov 80  }
  0x29   :  { %v66_v7 = vld [vmem:[%s4375_s1 + $0x38] sm:$0xff]  ;;  %v3708_v8 = vpack.c.bf16 %v61_v5, %v59_v3  ;;  %v63_v10 = vld [vmem:[%s4375_s1 + $0x20] sm:$0xff]  ;;  %v65_v11 = vld [vmem:[%s4375_s1 + $0x30] sm:$0xff]  ;;  %v4053_v21 = vshrl.u32 %v73_v20, 7  ;;  %3496 = vmatprep.mubr.msk.f32.mxu1 %vm3906_vm1, %v3905_v0  ;;  %s3909_s19 = smov 76   ;;  %vm167_vm2 = vcmask 31744  }
  0x2a   :  { %v3710_v9 = vpack.c.bf16 %v66_v7, %v64_v6  ;;  %v68_v12 = vld [vmem:[%s4375_s1 + $0x48] sm:$0xff]  ;;  %3707 = vmatprep.subr.bf16.mxu0 %v3706_v4  ;;  %v70_v13 = vld [vmem:[%s4375_s1 + $0x58] sm:$0xff]  ;;  %v3712_v14 = vpack.c.bf16 %v65_v11, %v63_v10  ;;  %v67_v16 = vld [vmem:[%s4375_s1 + $0x40] sm:$0xff]  ;;  %vm242_vm3 = vcmask 64512   ;;  %vm501_vm4 = vcmask 1043456   ;;  %s3911_s20 = smov 28  }
  0x2b   :  { %3709 = vmatpush1.bf16.msra.mxu0 %v3708_v8  ;;  %v3714_v15 = vpack.c.bf16 %v70_v13, %v68_v12  ;;  %v69_v17 = vld [vmem:[%s4375_s1 + $0x50] sm:$0xff]  ;;  %v58_v19 = vld [vmem:[%s4374_s0] sm:$0xff]  ;;  %v75_v22 = vsub.s32 0, %v4053_v21  ;;  %s3912_s21 = smov 72   ;;  %s3913_s22 = smov 120   ;;  %vm3221_vm5 = vcmask 1041408  }
  0x2c   :  { %3711 = vmatprep.subr.bf16.mxu0 %v3710_v9  ;;  %v3716_v18 = vpack.c.bf16 %v69_v17, %v67_v16  ;;  %v4063_v23 = vld [vmem:[%s4376_s2] sm:$0x3]  ;;  %s3910_s2 = smov 124   ;;  %v497_v60 = vld [vmem:[#allocation2 + $0x4] sm:$0xf]  ;;  %s3914_s23 = smov 24  }
  0x2d   :  { %v76_v24 = vrot.slane %v4063_v23, %v75_v22  ;;  %v330_v43 = vld [vmem:[#allocation2] sm:$0xf]  ;;  %s3915_s24 = smov 68   ;;  %s3916_s25 = smov 116   ;;  %vm3217_vm6 = vcmask 408576  }
  0x2e   :  { %s3917_s26 = smov 20   ;;  %s3919_s27 = smov 16  }
  0x2f   :  { %3713 = vmatpush1.bf16.msra.mxu0 %v3712_v14  ;;  %v817_v14 = vld [vmem:[#allocation2 + $0x8] sm:$0xf]  ;;  %s3920_s29 = smov 60   ;;  %s3921_s3 = smov 108  }
  0x30   :  { %3715 = vmatprep.subr.bf16.mxu0 %v3714_v15  ;;  %s3922_s30 = smov 12   ;;  %s3923_s9 = smov 56  }
  0x31   :  { %s3924_s10 = smov 104   ;;  %s3925_s11 = smov 52  }
  0x32   :  { %s3926_s12 = smov 100   ;;  %s3929_s13 = smov 44  }
  0x33   :  { %3717 = vmatpush1.bf16.msra.mxu0 %v3716_v18  ;;  %s3930_s14 = smov 92   ;;  %s3931_s1 = smov 88  }
  0x34   :  { %3519 = vmatprep.subr.mxu0 %v3905_v0  ;;  %s3932_s17 = smov 40  }
  0x36   :  { %3336 = vmatmul.mubr.msk.f32.vlgmr.msra.gmra.mrb[0].mxu0 %vm83_vm0, %v58_v19 }
  0x37   :  { %3521 = vmatprep.mubr.msk.f32.mxu0 %vm3906_vm1, %v3905_v0  ;;  %3520 = vmatpush3.msk.msra.mxu0 %vm501_vm4, %v330_v43  ;;  %v1061_v43 = vld [vmem:[#allocation2 + $0xc] sm:$0xf] }
  0x38   :  { %3529 = vmatprep.subr.mxu0 %v3905_v0 }
 0x109   :  { %v153_v25 = vpop.f32.mrb[0].mxu0 }
 0x10a   :  { %v4066_v26 = vadd.f32 %v153_v25, %v76_v24  ;;  %v4068_v27 = vpop.f32.mrb[1].mxu0 }
 0x10c   :  { %254 = vrot.lane.b32.xlu1 %v4066_v26, %s3907_s4  ;;  %165 = vrot.lane.b32.xlu0 %v4066_v26, %s3908_s18  ;;  %s3933_s4 = smov 84   ;;  %s3934_s18 = smov 36  }
 0x110   :  { %333 = vrot.lane.b32.xlu1 %v4066_v26, %s3909_s19 }
 0x17e   :  { %v166_v28 = vpop.permute.xlu0 %165  ;;  %v255_v29 = vpop.permute.xlu1 %254 }
 0x17f   :  { %3495 = vmatpush3.xpose.msk.msra.mxu1 %vm167_vm2, %v166_v28 }
 0x180   :  { %3499 = vmatprep.subr.mxu1 %v3905_v0 }
 0x182   :  { %3497 = vmatmul.mubr.msk.f32.vlgmr.msra.gmra.mrb[0].mxu1 %vm167_vm2, %v4066_v26  ;;  %v334_v38 = vpop.permute.xlu1 %333 }
 0x183   :  { %3500 = vmatpush3.msra.mxu1 %v255_v29  ;;  %3501 = vmatprep.mubr.msk.f32.mxu1 %vm3906_vm1, %v3905_v0 }
 0x184   :  { %3504 = vmatprep.subr.mxu1 %v3905_v0 }
 0x255   :  { %v238_v30 = vpop.f32.mrb[0].mxu1 }
 0x256   :  { %v3498_v31 = vpop.f32.mrb[1].mxu1  ;;  %v243_v32 = vsel %vm242_vm3, %v238_v30, -inf }
 0x257   :  { %244 = vmax.xlane.f32.xlu0 %v243_v32 }
 0x2e4   :  { %v245_v33 = vpop.xlane.xlu0 %244 }
 0x2e5   :  { %v246_v34 = vsub.f32 %v238_v30, %v245_v33 }
 0x2e7   :  { %v247_v35 = vmul.f32 1.442695, %v246_v34 }
 0x2e9   :  { %3774 = vpow2.f32 %v247_v35 }
 0x2f3   :  { %v3775_v36 = vpop.eup %3774 }
 0x2f4   :  { %v249_v37 = vsel %vm242_vm3, %v3775_v36, 0.0 }
 0x2f5   :  { %250 = vadd.xlane.f32.xlu1 %v249_v37 }
 0x306   :  { %331 = vrot.lane.b32.xlu1 %v4066_v26, %s3910_s2 }
 0x382   :  { %v251_v39 = vpop.xlane.xlu1 %250 }
 0x383   :  { %3776 = vrcp.f32 %v251_v39 }
 0x386   :  { %v332_v42 = vpop.permute.xlu1 %331 }
 0x38d   :  { %v3777_v40 = vpop.eup %3776 }
 0x38e   :  { %v253_v41 = vmul.f32 %v3777_v40, %v3775_v36 }
 0x390   :  { %3502 = vmatmul.mubr.msk.f32.vlgmr.msra.gmra.mrb[2].mxu1 %vm242_vm3, %v253_v41 }
 0x391   :  { %3505 = vmatpush3.xpose.msk.msra.mxu1 %vm167_vm2, %v334_v38  ;;  %3506 = vmatprep.mubr.msk.f32.mxu1 %vm3906_vm1, %v3905_v0 }
 0x392   :  { %3509 = vmatprep.subr.mxu1 %v3905_v0 }
 0x394   :  { %3507 = vmatmul.mubr.msk.f32.vlgmr.msra.gmra.mrb[4].mxu1 %vm167_vm2, %v332_v42 }
 0x395   :  { %3511 = vmatprep.mubr.msk.f32.mxu1 %vm3906_vm1, %v3905_v0 }
 0x463   :  { %v326_v44 = vpop.f32.mrb[2].mxu1 }
 0x464   :  { %v3503_v45 = vpop.f32.mrb[3].mxu1  ;;  %3522 = vmatmul.mubr.msk.f32.vlgmr.msra.gmra.mrb[2].mxu0 %vm167_vm2, %v326_v44 }
 0x465   :  { %3531 = vmatprep.mubr.msk.f32.mxu0 %vm3906_vm1, %v3905_v0 }
 0x467   :  { %v405_v46 = vpop.f32.mrb[4].mxu1 }
 0x468   :  { %v3508_v47 = vpop.f32.mrb[5].mxu1  ;;  %v409_v48 = vsel %vm242_vm3, %v405_v46, -inf }
 0x469   :  { %410 = vmax.xlane.f32.xlu1 %v409_v48 }
 0x4f6   :  { %v411_v49 = vpop.xlane.xlu1 %410 }
 0x4f7   :  { %v412_v50 = vsub.f32 %v405_v46, %v411_v49 }
 0x4f9   :  { %v413_v51 = vmul.f32 1.442695, %v412_v50 }
 0x4fb   :  { %3778 = vpow2.f32 %v413_v51 }
 0x505   :  { %v3779_v52 = vpop.eup %3778 }
 0x506   :  { %v415_v53 = vsel %vm242_vm3, %v3779_v52, 0.0 }
 0x507   :  { %416 = vadd.xlane.f32.xlu0 %v415_v53 }
 0x51d   :  { %420 = vrot.lane.b32.xlu0 %v4066_v26, %s3911_s20 }
 0x521   :  { %653 = vrot.lane.b32.xlu0 %v4066_v26, %s3912_s21 }
 0x525   :  { %651 = vrot.lane.b32.xlu0 %v4066_v26, %s3913_s22 }
 0x537   :  { %v647_v54 = vpop.f32.mrb[2].mxu0 }
 0x538   :  { %v3523_v55 = vpop.f32.mrb[3].mxu0 }
 0x539   :  { %v1305_v55 = vld [vmem:[#allocation2 + $0x10] sm:$0xf] }
 0x594   :  { %v417_v56 = vpop.xlane.xlu0 %416 }
 0x595   :  { %3780 = vrcp.f32 %v417_v56 }
 0x598   :  { %v421_v57 = vpop.permute.xlu0 %420 }
 0x599   :  { %3510 = vmatpush3.msra.mxu1 %v421_v57 }
 0x59a   :  { %3514 = vmatprep.subr.mxu1 %v3905_v0 }
 0x59c   :  { %v654_v61 = vpop.permute.xlu0 %653 }
 0x59f   :  { %v3781_v58 = vpop.eup %3780 }
 0x5a0   :  { %v419_v59 = vmul.f32 %v3781_v58, %v3779_v52  ;;  %v652_v1 = vpop.permute.xlu0 %651 }
 0x5a2   :  { %3512 = vmatmul.mubr.msk.f32.vlgmr.msra.gmra.mrb[6].mxu1 %vm242_vm3, %v419_v59 }
 0x5a3   :  { %3515 = vmatpush3.msk.msra.mxu1 %vm501_vm4, %v497_v60  ;;  %3516 = vmatprep.mubr.msk.f32.mxu1 %vm3906_vm1, %v3905_v0 }
 0x5a4   :  { %3524 = vmatprep.subr.mxu1 %v3905_v0 }
 0x675   :  { %v492_v62 = vpop.f32.mrb[6].mxu1 }
 0x676   :  { %v3513_v63 = vpop.f32.mrb[7].mxu1  ;;  %3517 = vmatmul.mubr.msk.f32.vlgmr.msra.gmra.mrb[8].mxu1 %vm167_vm2, %v492_v62 }
 0x677   :  { %3525 = vmatpush3.xpose.msk.msra.mxu1 %vm167_vm2, %v654_v61  ;;  %3526 = vmatprep.mubr.msk.f32.mxu1 %vm3906_vm1, %v3905_v0 }
 0x678   :  { %3534 = vmatprep.subr.mxu1 %v3905_v0 }
 0x67a   :  { %3527 = vmatmul.mubr.msk.f32.vlgmr.msra.gmra.mrb[10].mxu1 %vm167_vm2, %v652_v1 }
 0x67b   :  { %3536 = vmatprep.mubr.msk.f32.mxu1 %vm3906_vm1, %v3905_v0  ;;  %3535 = vmatpush3.msk.msra.mxu1 %vm501_vm4, %v817_v14 }
 0x67c   :  { %3544 = vmatprep.subr.mxu1 %v3905_v0 }
 0x749   :  { %v571_v2 = vpop.f32.mrb[8].mxu1 }
 0x74a   :  { %v648_v3 = vadd.f32 %v647_v54, %v571_v2  ;;  %v3518_v4 = vpop.f32.mrb[9].mxu1 }
 0x74d   :  { %v725_v5 = vpop.f32.mrb[10].mxu1 }
 0x74e   :  { %v3528_v6 = vpop.f32.mrb[11].mxu1  ;;  %v729_v7 = vsel %vm242_vm3, %v725_v5, -inf }
 0x74f   :  { %730 = vmax.xlane.f32.xlu1 %v729_v7 }
 0x760   :  { %740 = vrot.lane.b32.xlu1 %v4066_v26, %s3914_s23 }
 0x764   :  { %897 = vrot.lane.b32.xlu1 %v4066_v26, %s3915_s24 }
 0x768   :  { %895 = vrot.lane.b32.xlu1 %v4066_v26, %s3916_s25 }
 0x7dc   :  { %v731_v8 = vpop.xlane.xlu1 %730 }
 0x7dd   :  { %v732_v9 = vsub.f32 %v725_v5, %v731_v8 }
 0x7df   :  { %v733_v10 = vmul.f32 1.442695, %v732_v9 }
 0x7e0   :  { %v741_v11 = vpop.permute.xlu1 %740 }
 0x7e1   :  { %3782 = vpow2.f32 %v733_v10  ;;  %3530 = vmatpush3.msra.mxu0 %v741_v11 }
 0x7e2   :  { %3539 = vmatprep.subr.mxu0 %v3905_v0 }
 0x7e4   :  { %v898_v17 = vpop.permute.xlu1 %897 }
 0x7e8   :  { %v896_v19 = vpop.permute.xlu1 %895 }
 0x7eb   :  { %v3783_v12 = vpop.eup %3782 }
 0x7ec   :  { %v735_v13 = vsel %vm242_vm3, %v3783_v12, 0.0 }
 0x7ed   :  { %736 = vadd.xlane.f32.xlu0 %v735_v13 }
 0x803   :  { %984 = vrot.lane.b32.xlu0 %v4066_v26, %s3917_s26 }
 0x807   :  { %1141 = vrot.lane.b32.xlu0 %v4066_v26, %s3900_s15  ;;  %s3918_s15 = smov 112  }
 0x87a   :  { %v737_v15 = vpop.xlane.xlu0 %736 }
 0x87b   :  { %3784 = vrcp.f32 %v737_v15 }
 0x87e   :  { %v985_v22 = vpop.permute.xlu0 %984 }
 0x882   :  { %v1142_v38 = vpop.permute.xlu0 %1141 }
 0x885   :  { %v3785_v16 = vpop.eup %3784 }
 0x886   :  { %v739_v18 = vmul.f32 %v3785_v16, %v3783_v12 }
 0x888   :  { %3532 = vmatmul.mubr.msk.f32.vlgmr.msra.gmra.mrb[4].mxu0 %vm242_vm3, %v739_v18 }
 0x889   :  { %3540 = vmatpush3.xpose.msk.msra.mxu0 %vm167_vm2, %v898_v17  ;;  %3541 = vmatprep.mubr.msk.f32.mxu0 %vm3906_vm1, %v3905_v0 }
 0x88a   :  { %3549 = vmatprep.subr.mxu0 %v3905_v0 }
 0x88c   :  { %3542 = vmatmul.mubr.msk.f32.vlgmr.msra.gmra.mrb[6].mxu0 %vm167_vm2, %v896_v19 }
 0x88d   :  { %3551 = vmatprep.mubr.msk.f32.mxu0 %vm3906_vm1, %v3905_v0  ;;  %3550 = vmatpush3.msk.msra.mxu0 %vm501_vm4, %v1061_v43 }
 0x88e   :  { %3559 = vmatprep.subr.mxu0 %v3905_v0 }
 0x95b   :  { %v812_v20 = vpop.f32.mrb[4].mxu0 }
 0x95c   :  { %v3533_v24 = vpop.f32.mrb[5].mxu0  ;;  %3537 = vmatmul.mubr.msk.f32.vlgmr.msra.gmra.mrb[12].mxu1 %vm167_vm2, %v812_v20  ;;  %v1549_v20 = vld [vmem:[#allocation2 + $0x14] sm:$0xf] }
 0x95d   :  { %3545 = vmatpush3.msra.mxu1 %v985_v22  ;;  %3546 = vmatprep.mubr.msk.f32.mxu1 %vm3906_vm1, %v3905_v0 }
 0x95e   :  { %3554 = vmatprep.subr.mxu1 %v3905_v0 }
 0x95f   :  { %v969_v25 = vpop.f32.mrb[6].mxu0 }
 0x960   :  { %v3543_v28 = vpop.f32.mrb[7].mxu0  ;;  %v973_v29 = vsel %vm242_vm3, %v969_v25, -inf }
 0x961   :  { %974 = vmax.xlane.f32.xlu1 %v973_v29 }
 0x9ee   :  { %v975_v30 = vpop.xlane.xlu1 %974 }
 0x9ef   :  { %v976_v31 = vsub.f32 %v969_v25, %v975_v30 }
 0x9f1   :  { %v977_v32 = vmul.f32 1.442695, %v976_v31 }
 0x9f3   :  { %3786 = vpow2.f32 %v977_v32 }
 0x9fd   :  { %v3787_v33 = vpop.eup %3786 }
 0x9fe   :  { %v979_v34 = vsel %vm242_vm3, %v3787_v33, 0.0 }
 0x9ff   :  { %980 = vadd.xlane.f32.xlu0 %v979_v34 }
 0xa15   :  { %1139 = vrot.lane.b32.xlu0 %v4066_v26, %s3918_s15 }
 0xa2f   :  { %v890_v35 = vpop.f32.mrb[12].mxu1 }
 0xa30   :  { %v894_v36 = vadd.f32 %v890_v35, %v648_v3  ;;  %v3538_v37 = vpop.f32.mrb[13].mxu1 }
 0xa8c   :  { %v981_v39 = vpop.xlane.xlu0 %980 }
 0xa8d   :  { %3788 = vrcp.f32 %v981_v39 }
 0xa90   :  { %v1140_v42 = vpop.permute.xlu0 %1139 }
 0xa97   :  { %v3789_v40 = vpop.eup %3788 }
 0xa98   :  { %v983_v41 = vmul.f32 %v3789_v40, %v3787_v33 }
 0xa9a   :  { %3547 = vmatmul.mubr.msk.f32.vlgmr.msra.gmra.mrb[14].mxu1 %vm242_vm3, %v983_v41 }
 0xa9b   :  { %3555 = vmatpush3.xpose.msk.msra.mxu1 %vm167_vm2, %v1142_v38  ;;  %3556 = vmatprep.mubr.msk.f32.mxu1 %vm3906_vm1, %v3905_v0 }
 0xa9c   :  { %3564 = vmatprep.subr.mxu1 %v3905_v0 }
 0xa9e   :  { %3557 = vmatmul.mubr.msk.f32.vlgmr.msra.gmra.mrb[16].mxu1 %vm167_vm2, %v1140_v42 }
 0xa9f   :  { %3566 = vmatprep.mubr.msk.f32.mxu1 %vm3906_vm1, %v3905_v0  ;;  %3565 = vmatpush3.msk.msra.mxu1 %vm501_vm4, %v1305_v55 }
 0xaa0   :  { %3574 = vmatprep.subr.mxu1 %v3905_v0 }
 0xb6d   :  { %v1056_v44 = vpop.f32.mrb[14].mxu1 }
 0xb6e   :  { %v3548_v45 = vpop.f32.mrb[15].mxu1  ;;  %3552 = vmatmul.mubr.msk.f32.vlgmr.msra.gmra.mrb[8].mxu0 %vm167_vm2, %v1056_v44 }
 0xb6f   :  { %3561 = vmatprep.mubr.msk.f32.mxu0 %vm3906_vm1, %v3905_v0 }
 0xb71   :  { %v1213_v46 = vpop.f32.mrb[16].mxu1 }
 0xb72   :  { %v3558_v47 = vpop.f32.mrb[17].mxu1  ;;  %v1217_v48 = vsel %vm242_vm3, %v1213_v46, -inf }
 0xb73   :  { %1218 = vmax.xlane.f32.xlu1 %v1217_v48 }
 0xb84   :  { %1228 = vrot.lane.b32.xlu1 %v4066_v26, %s3919_s27 }
 0xb88   :  { %1385 = vrot.lane.b32.xlu1 %v4066_v26, %s3920_s29 }
 0xb8c   :  { %1383 = vrot.lane.b32.xlu1 %v4066_v26, %s3921_s3 }
 0xc00   :  { %v1219_v49 = vpop.xlane.xlu1 %1218 }
 0xc01   :  { %v1220_v50 = vsub.f32 %v1213_v46, %v1219_v49 }
 0xc03   :  { %v1221_v51 = vmul.f32 1.442695, %v1220_v50 }
 0xc04   :  { %v1229_v52 = vpop.permute.xlu1 %1228 }
 0xc05   :  { %3790 = vpow2.f32 %v1221_v51  ;;  %3560 = vmatpush3.msra.mxu0 %v1229_v52 }
 0xc06   :  { %3569 = vmatprep.subr.mxu0 %v3905_v0 }
 0xc08   :  { %v1386_v61 = vpop.permute.xlu1 %1385 }
 0xc0c   :  { %v1384_v63 = vpop.permute.xlu1 %1383 }
 0xc0f   :  { %v3791_v53 = vpop.eup %3790 }
 0xc10   :  { %v1223_v54 = vsel %vm242_vm3, %v3791_v53, 0.0 }
 0xc11   :  { %1224 = vadd.xlane.f32.xlu0 %v1223_v54 }
 0xc27   :  { %1472 = vrot.lane.b32.xlu0 %v4066_v26, %s3922_s30 }
 0xc2b   :  { %1629 = vrot.lane.b32.xlu0 %v4066_v26, %s3923_s9 }
 0xc41   :  { %v1134_v56 = vpop.f32.mrb[8].mxu0 }
 0xc42   :  { %v1138_v57 = vadd.f32 %v1134_v56, %v894_v36  ;;  %v3553_v58 = vpop.f32.mrb[9].mxu0  ;;  %v1793_v36 = vld [vmem:[#allocation2 + $0x18] sm:$0xf]  ;;  %v2037_v56 = vld [vmem:[#allocation2 + $0x1c] sm:$0xf] }
 0xc9e   :  { %v1225_v59 = vpop.xlane.xlu0 %1224 }
 0xc9f   :  { %3792 = vrcp.f32 %v1225_v59 }
 0xca2   :  { %v1473_v2 = vpop.permute.xlu0 %1472 }
 0xca6   :  { %v1630_v15 = vpop.permute.xlu0 %1629 }
 0xca9   :  { %v3793_v60 = vpop.eup %3792 }
 0xcaa   :  { %v1227_v62 = vmul.f32 %v3793_v60, %v3791_v53 }
 0xcac   :  { %3562 = vmatmul.mubr.msk.f32.vlgmr.msra.gmra.mrb[10].mxu0 %vm242_vm3, %v1227_v62 }
 0xcad   :  { %3570 = vmatpush3.xpose.msk.msra.mxu0 %vm167_vm2, %v1386_v61  ;;  %3571 = vmatprep.mubr.msk.f32.mxu0 %vm3906_vm1, %v3905_v0 }
 0xcae   :  { %3579 = vmatprep.subr.mxu0 %v3905_v0 }
 0xcb0   :  { %3572 = vmatmul.mubr.msk.f32.vlgmr.msra.gmra.mrb[12].mxu0 %vm167_vm2, %v1384_v63 }
 0xcb1   :  { %3581 = vmatprep.mubr.msk.f32.mxu0 %vm3906_vm1, %v3905_v0  ;;  %3580 = vmatpush3.msk.msra.mxu0 %vm501_vm4, %v1549_v20 }
 0xcb2   :  { %3589 = vmatprep.subr.mxu0 %v3905_v0 }
 0xd7f   :  { %v1300_v1 = vpop.f32.mrb[10].mxu0 }
 0xd80   :  { %v3563_v3 = vpop.f32.mrb[11].mxu0  ;;  %3567 = vmatmul.mubr.msk.f32.vlgmr.msra.gmra.mrb[18].mxu1 %vm167_vm2, %v1300_v1 }
 0xd81   :  { %3575 = vmatpush3.msra.mxu1 %v1473_v2  ;;  %3576 = vmatprep.mubr.msk.f32.mxu1 %vm3906_vm1, %v3905_v0  ;;  %v79_v2 = vsub.s32 1, %v4053_v21 }
 0xd82   :  { %3584 = vmatprep.subr.mxu1 %v3905_v0 }
 0xd83   :  { %v1457_v4 = vpop.f32.mrb[12].mxu0  ;;  %v80_v3 = vrot.slane %v4063_v23, %v79_v2 }
 0xd84   :  { %v3573_v5 = vpop.f32.mrb[13].mxu0  ;;  %v1461_v6 = vsel %vm242_vm3, %v1457_v4, -inf }
 0xd85   :  { %1462 = vmax.xlane.f32.xlu1 %v1461_v6 }
 0xe12   :  { %v1463_v7 = vpop.xlane.xlu1 %1462 }
 0xe13   :  { %v1464_v8 = vsub.f32 %v1457_v4, %v1463_v7  ;;  %v4235_v4 = vadd.f32 %v4068_v27, %v80_v3 }
 0xe15   :  { %v1465_v9 = vmul.f32 1.442695, %v1464_v8 }
 0xe17   :  { %3794 = vpow2.f32 %v1465_v9 }
 0xe21   :  { %v3795_v10 = vpop.eup %3794 }
 0xe22   :  { %v1467_v11 = vsel %vm242_vm3, %v3795_v10, 0.0 }
 0xe23   :  { %1468 = vadd.xlane.f32.xlu0 %v1467_v11 }
 0xe39   :  { %1627 = vrot.lane.b32.xlu0 %v4066_v26, %s3924_s10 }
 0xe53   :  { %v1378_v12 = vpop.f32.mrb[18].mxu1 }
 0xe54   :  { %v1382_v13 = vadd.f32 %v1378_v12, %v1138_v57  ;;  %v3568_v14 = vpop.f32.mrb[19].mxu1  ;;  %v2278_v12 = vld [vmem:[#allocation2 + $0x20] sm:$0xf] }
 0xeb0   :  { %v1469_v16 = vpop.xlane.xlu0 %1468 }
 0xeb1   :  { %3796 = vrcp.f32 %v1469_v16 }
 0xeb4   :  { %v1628_v19 = vpop.permute.xlu0 %1627 }
 0xebb   :  { %v3797_v17 = vpop.eup %3796 }
 0xebc   :  { %v1471_v18 = vmul.f32 %v3797_v17, %v3795_v10 }
 0xebe   :  { %3577 = vmatmul.mubr.msk.f32.vlgmr.msra.gmra.mrb[20].mxu1 %vm242_vm3, %v1471_v18 }
 0xebf   :  { %3585 = vmatpush3.xpose.msk.msra.mxu1 %vm167_vm2, %v1630_v15  ;;  %3586 = vmatprep.mubr.msk.f32.mxu1 %vm3906_vm1, %v3905_v0 }
 0xec0   :  { %3594 = vmatprep.subr.mxu1 %v3905_v0 }
 0xec2   :  { %3587 = vmatmul.mubr.msk.f32.vlgmr.msra.gmra.mrb[22].mxu1 %vm167_vm2, %v1628_v19 }
 0xec3   :  { %3596 = vmatprep.mubr.msk.f32.mxu1 %vm3906_vm1, %v3905_v0  ;;  %3595 = vmatpush3.msk.msra.mxu1 %vm501_vm4, %v1793_v36 }
 0xec4   :  { %3604 = vmatprep.subr.mxu1 %v3905_v0 }
 0xf91   :  { %v1544_v22 = vpop.f32.mrb[20].mxu1 }
 0xf92   :  { %v3578_v24 = vpop.f32.mrb[21].mxu1  ;;  %3582 = vmatmul.mubr.msk.f32.vlgmr.msra.gmra.mrb[14].mxu0 %vm167_vm2, %v1544_v22 }
 0xf93   :  { %3591 = vmatprep.mubr.msk.f32.mxu0 %vm3906_vm1, %v3905_v0 }
 0xf95   :  { %v1701_v25 = vpop.f32.mrb[22].mxu1 }
 0xf96   :  { %v3588_v28 = vpop.f32.mrb[23].mxu1  ;;  %v1705_v29 = vsel %vm242_vm3, %v1701_v25, -inf }
 0xf97   :  { %1706 = vmax.xlane.f32.xlu1 %v1705_v29 }
 0xfa8   :  { %1716 = vrot.lane.b32.xlu1 %v4066_v26, %s3904_s28  ;;  %s3927_s28 = smov 48  }
 0xfac   :  { %1873 = vrot.lane.b32.xlu1 %v4066_v26, %s3925_s11 }
 0xfb0   :  { %1871 = vrot.lane.b32.xlu1 %v4066_v26, %s3926_s12 }
0x1024   :  { %v1707_v30 = vpop.xlane.xlu1 %1706 }
0x1025   :  { %v1708_v31 = vsub.f32 %v1701_v25, %v1707_v30 }
0x1027   :  { %v1709_v32 = vmul.f32 1.442695, %v1708_v31 }
0x1028   :  { %v1717_v33 = vpop.permute.xlu1 %1716 }
0x1029   :  { %3798 = vpow2.f32 %v1709_v32  ;;  %3590 = vmatpush3.msra.mxu0 %v1717_v33 }
0x102a   :  { %3599 = vmatprep.subr.mxu0 %v3905_v0 }
0x102c   :  { %v1874_v42 = vpop.permute.xlu1 %1873 }
0x1030   :  { %v1872_v44 = vpop.permute.xlu1 %1871 }
0x1033   :  { %v3799_v34 = vpop.eup %3798 }
0x1034   :  { %v1711_v35 = vsel %vm242_vm3, %v3799_v34, 0.0 }
0x1035   :  { %1712 = vadd.xlane.f32.xlu0 %v1711_v35 }
0x104b   :  { %1960 = vrot.lane.b32.xlu0 %v4066_v26, %s3901_s16  ;;  %s3928_s16 = smov 96  }
0x104f   :  { %2117 = vrot.lane.b32.xlu0 %v4066_v26, %s3927_s28 }
0x1065   :  { %v1622_v37 = vpop.f32.mrb[14].mxu0 }
0x1066   :  { %v1626_v38 = vadd.f32 %v1622_v37, %v1382_v13  ;;  %v3583_v39 = vpop.f32.mrb[15].mxu0 }
0x10c2   :  { %v1713_v40 = vpop.xlane.xlu0 %1712 }
0x10c3   :  { %3800 = vrcp.f32 %v1713_v40 }
0x10c6   :  { %v1961_v46 = vpop.permute.xlu0 %1960 }
0x10ca   :  { %v2118_v60 = vpop.permute.xlu0 %2117 }
0x10cd   :  { %v3801_v41 = vpop.eup %3800 }
0x10ce   :  { %v1715_v43 = vmul.f32 %v3801_v41, %v3799_v34 }
0x10d0   :  { %3592 = vmatmul.mubr.msk.f32.vlgmr.msra.gmra.mrb[16].mxu0 %vm242_vm3, %v1715_v43 }
0x10d1   :  { %3600 = vmatpush3.xpose.msk.msra.mxu0 %vm167_vm2, %v1874_v42  ;;  %3601 = vmatprep.mubr.msk.f32.mxu0 %vm3906_vm1, %v3905_v0 }
0x10d2   :  { %3609 = vmatprep.subr.mxu0 %v3905_v0 }
0x10d4   :  { %3602 = vmatmul.mubr.msk.f32.vlgmr.msra.gmra.mrb[18].mxu0 %vm167_vm2, %v1872_v44  ;;  %v2523_v44 = vld [vmem:[#allocation2 + $0x24] sm:$0xf] }
0x10d5   :  { %3611 = vmatprep.mubr.msk.f32.mxu0 %vm3906_vm1, %v3905_v0  ;;  %3610 = vmatpush3.msk.msra.mxu0 %vm501_vm4, %v2037_v56 }
0x10d6   :  { %3619 = vmatprep.subr.mxu0 %v3905_v0 }
0x11a3   :  { %v1788_v45 = vpop.f32.mrb[16].mxu0 }
0x11a4   :  { %v3593_v47 = vpop.f32.mrb[17].mxu0  ;;  %3597 = vmatmul.mubr.msk.f32.vlgmr.msra.gmra.mrb[24].mxu1 %vm167_vm2, %v1788_v45 }
0x11a5   :  { %3605 = vmatpush3.msra.mxu1 %v1961_v46  ;;  %3606 = vmatprep.mubr.msk.f32.mxu1 %vm3906_vm1, %v3905_v0 }
0x11a6   :  { %3614 = vmatprep.subr.mxu1 %v3905_v0 }
0x11a7   :  { %v1945_v48 = vpop.f32.mrb[18].mxu0 }
0x11a8   :  { %v3603_v49 = vpop.f32.mrb[19].mxu0  ;;  %v1949_v50 = vsel %vm242_vm3, %v1945_v48, -inf }
0x11a9   :  { %1950 = vmax.xlane.f32.xlu1 %v1949_v50 }
0x1236   :  { %v1951_v51 = vpop.xlane.xlu1 %1950 }
0x1237   :  { %v1952_v52 = vsub.f32 %v1945_v48, %v1951_v51 }
0x1239   :  { %v1953_v53 = vmul.f32 1.442695, %v1952_v52 }
0x123b   :  { %3802 = vpow2.f32 %v1953_v53 }
0x1245   :  { %v3803_v54 = vpop.eup %3802 }
0x1246   :  { %v1955_v55 = vsel %vm242_vm3, %v3803_v54, 0.0 }
0x1247   :  { %1956 = vadd.xlane.f32.xlu0 %v1955_v55 }
0x125d   :  { %2115 = vrot.lane.b32.xlu0 %v4066_v26, %s3928_s16 }
0x1277   :  { %v1866_v57 = vpop.f32.mrb[24].mxu1 }
0x1278   :  { %v1870_v58 = vadd.f32 %v1866_v57, %v1626_v38  ;;  %v3598_v59 = vpop.f32.mrb[25].mxu1 }
0x12d4   :  { %v1957_v61 = vpop.xlane.xlu0 %1956 }
0x12d5   :  { %3804 = vrcp.f32 %v1957_v61 }
0x12d8   :  { %v2116_v1 = vpop.permute.xlu0 %2115 }
0x12df   :  { %v3805_v62 = vpop.eup %3804 }
0x12e0   :  { %v1959_v63 = vmul.f32 %v3805_v62, %v3803_v54 }
0x12e2   :  { %3607 = vmatmul.mubr.msk.f32.vlgmr.msra.gmra.mrb[26].mxu1 %vm242_vm3, %v1959_v63 }
0x12e3   :  { %3615 = vmatpush3.xpose.msk.msra.mxu1 %vm167_vm2, %v2118_v60  ;;  %3616 = vmatprep.mubr.msk.f32.mxu1 %vm3906_vm1, %v3905_v0 }
0x12e4   :  { %3624 = vmatprep.subr.mxu1 %v3905_v0 }
0x12e6   :  { %3617 = vmatmul.mubr.msk.f32.vlgmr.msra.gmra.mrb[28].mxu1 %vm167_vm2, %v2116_v1 }
0x12e7   :  { %3626 = vmatprep.mubr.msk.f32.mxu1 %vm3906_vm1, %v3905_v0  ;;  %3625 = vmatpush3.msk.msra.mxu1 %vm501_vm4, %v2278_v12 }
0x12e8   :  { %3634 = vmatprep.subr.mxu1 %v3905_v0 }
0x13b5   :  { %v2032_v5 = vpop.f32.mrb[26].mxu1 }
0x13b6   :  { %v3608_v6 = vpop.f32.mrb[27].mxu1  ;;  %3612 = vmatmul.mubr.msk.f32.vlgmr.msra.gmra.mrb[20].mxu0 %vm167_vm2, %v2032_v5 }
0x13b7   :  { %3620 = vmatpush3.msra.mxu0 %v4235_v4  ;;  %3621 = vmatprep.mubr.msk.f32.mxu0 %vm3906_vm1, %v3905_v0 }
0x13b8   :  { %3629 = vmatprep.subr.mxu0 %v3905_v0 }
0x13b9   :  { %v2189_v7 = vpop.f32.mrb[28].mxu1 }
0x13ba   :  { %v3618_v8 = vpop.f32.mrb[29].mxu1  ;;  %v2193_v21 = vsel %vm242_vm3, %v2189_v7, -inf }
0x13bb   :  { %2194 = vmax.xlane.f32.xlu1 %v2193_v21 }
0x13cc   :  { %2358 = vrot.lane.b32.xlu1 %v4066_v26, %s3929_s13 }
0x13d0   :  { %2356 = vrot.lane.b32.xlu1 %v4066_v26, %s3930_s14 }
0x1448   :  { %v2195_v23 = vpop.xlane.xlu1 %2194 }
0x1449   :  { %v2196_v27 = vsub.f32 %v2189_v7, %v2195_v23 }
0x144b   :  { %v2197_v9 = vmul.f32 1.442695, %v2196_v27 }
0x144c   :  { %v2359_v18 = vpop.permute.xlu1 %2358 }
0x144d   :  { %3806 = vpow2.f32 %v2197_v9 }
0x1450   :  { %v2357_v20 = vpop.permute.xlu1 %2356 }
0x1457   :  { %v3807_v10 = vpop.eup %3806 }
0x1458   :  { %v2199_v11 = vsel %vm242_vm3, %v3807_v10, 0.0 }
0x1459   :  { %2200 = vadd.xlane.f32.xlu0 %v2199_v11 }
0x146f   :  { %2446 = vrot.lane.b32.xlu0 %v4235_v4, %s3910_s2  ;;  %s3936_s2 = smov [#allocation7]  }
0x1470   :  { %s3326_s20 = sshll.u32 %s3936_s2, 4  ;;  %s3327_s20 = int_to_ptr.vmem [resolvable:$true] %s3326_s20 }
0x1471   :  { %s3871_s21 = scalar_lea.vmem %s3327_s20, 128  ;;  %p3876_p3 = scmp.lt.s32.totalorder %s3327_s20, %s3327_s20 }
0x1472   :  { %p3872_p2 = scmp.ne.s32.totalorder %s3327_s20, %s3871_s21  ;;  %p3877_p4 = scmp.lt.s32.totalorder %s3871_s21, %s3871_s21 }
0x1474   :  { %p3878_p5 = por %p3877_p4, %p3876_p3 }
0x1476   :  { %p3879_p6 = pnand %p3878_p5, %p3872_p2 }
0x1489   :  { %v2110_v13 = vpop.f32.mrb[20].mxu0 }
0x148a   :  { %v2114_v14 = vadd.f32 %v2110_v13, %v1870_v58  ;;  %v3613_v15 = vpop.f32.mrb[21].mxu0 }
0x14e6   :  { %v2201_v16 = vpop.xlane.xlu0 %2200 }
0x14e7   :  { %3808 = vrcp.f32 %v2201_v16 }
0x14ea   :  { %v2447_v24 = vpop.permute.xlu0 %2446 }
0x14f1   :  { %v3809_v17 = vpop.eup %3808 }
0x14f2   :  { %v2203_v19 = vmul.f32 %v3809_v17, %v3807_v10  ;;  %v3011_v10 = vld [vmem:[#allocation2 + $0x2c] sm:$0xf] }
0x14f4   :  { %3622 = vmatmul.mubr.msk.f32.vlgmr.msra.gmra.mrb[22].mxu0 %vm242_vm3, %v2203_v19 }
0x14f5   :  { %3630 = vmatpush3.xpose.msk.msra.mxu0 %vm167_vm2, %v2359_v18  ;;  %3631 = vmatprep.mubr.msk.f32.mxu0 %vm3906_vm1, %v3905_v0  ;;  %v3397_v18 = vld [vmem:[%s4381_s7] ss:$0 sm:$0xff] }
0x14f6   :  { %3639 = vmatprep.subr.mxu0 %v3905_v0 }
0x14f8   :  { %3632 = vmatmul.mubr.msk.f32.vlgmr.msra.gmra.mrb[24].mxu0 %vm167_vm2, %v2357_v20 }
0x14f9   :  { %3641 = vmatprep.mubr.msk.f32.mxu0 %vm3906_vm1, %v3905_v0  ;;  %3640 = vmatpush3.msk.msra.mxu0 %vm501_vm4, %v2523_v44 }
0x14fa   :  { %3649 = vmatprep.subr.mxu0 %v3905_v0 }
0x15c7   :  { %v2273_v22 = vpop.f32.mrb[22].mxu0 }
0x15c8   :  { %v3623_v25 = vpop.f32.mrb[23].mxu0  ;;  %3627 = vmatmul.mubr.msk.f32.vlgmr.msra.gmra.mrb[30].mxu1 %vm167_vm2, %v2273_v22 }
0x15c9   :  { %3635 = vmatpush3.msra.mxu1 %v2447_v24  ;;  %3636 = vmatprep.mubr.msk.f32.mxu1 %vm3906_vm1, %v3905_v0  ;;  %v3826_v25 = vld [vmem:[%s4374_s0] sm:$0xff] }
0x15ca   :  { %3644 = vmatprep.subr.mxu1 %v3905_v0 }
0x15cb   :  { %v2430_v28 = vpop.f32.mrb[24].mxu0 }
0x15cc   :  { %v3633_v29 = vpop.f32.mrb[25].mxu0  ;;  %v2434_v30 = vsel %vm242_vm3, %v2430_v28, -inf }
0x15cd   :  { %2435 = vmax.xlane.f32.xlu1 %v2434_v30 }
0x15de   :  { %2601 = vrot.lane.b32.xlu1 %v4066_v26, %s3931_s1 }
0x165a   :  { %v2436_v31 = vpop.xlane.xlu1 %2435 }
0x165b   :  { %v2437_v32 = vsub.f32 %v2430_v28, %v2436_v31 }
0x165d   :  { %v2438_v33 = vmul.f32 1.442695, %v2437_v32 }
0x165e   :  { %v2602_v43 = vpop.permute.xlu1 %2601 }
0x165f   :  { %3810 = vpow2.f32 %v2438_v33 }
0x1669   :  { %v3811_v34 = vpop.eup %3810 }
0x166a   :  { %v2440_v35 = vsel %vm242_vm3, %v3811_v34, 0.0 }
0x166b   :  { %2441 = vadd.xlane.f32.xlu0 %v2440_v35  ;;  %v3119_v35 = vld [vmem:[#allocation5] sm:$0xff] }
0x1681   :  { %2603 = vrot.lane.b32.xlu0 %v4066_v26, %s3932_s17 }
0x169b   :  { %v2351_v36 = vpop.f32.mrb[30].mxu1 }
0x169c   :  { %v2355_v37 = vadd.f32 %v2351_v36, %v2114_v14  ;;  %v3628_v38 = vpop.f32.mrb[31].mxu1  ;;  %v3120_v36 = vld [vmem:[#allocation5 + $0x8] sm:$0xff] }
0x169d   :  { %v3935_v38 = vmov 0.0|0.0  }
0x16f8   :  { %v2442_v39 = vpop.xlane.xlu0 %2441 }
0x16f9   :  { %3812 = vrcp.f32 %v2442_v39  ;;  %v3121_v39 = vld [vmem:[#allocation5 + $0x10] sm:$0xff] }
0x16fc   :  { %v2604_v42 = vpop.permute.xlu0 %2603 }
0x1703   :  { %v3813_v40 = vpop.eup %3812 }
0x1704   :  { %v2444_v41 = vmul.f32 %v3813_v40, %v3811_v34  ;;  %v3122_v40 = vld [vmem:[#allocation5 + $0x18] sm:$0xff] }
0x1706   :  { %3637 = vmatmul.mubr.msk.f32.vlgmr.msra.gmra.mrb[32].mxu1 %vm242_vm3, %v2444_v41  ;;  %v3722_v41 = vpack.c.bf16 %v3122_v40, %v3121_v39 }
0x1707   :  { %3645 = vmatpush3.xpose.msk.msra.mxu1 %vm167_vm2, %v2604_v42  ;;  %3646 = vmatprep.mubr.msk.f32.mxu1 %vm3906_vm1, %v3905_v0  ;;  %v3123_v42 = vld [vmem:[#allocation5 + $0x20] sm:$0xff] }
0x1708   :  { %3654 = vmatprep.subr.mxu1 %v3905_v0 }
0x170a   :  { %3647 = vmatmul.mubr.msk.f32.vlgmr.msra.gmra.mrb[34].mxu1 %vm167_vm2, %v2602_v43  ;;  %v3124_v43 = vld [vmem:[#allocation5 + $0x28] sm:$0xff] }
0x170b   :  { %3656 = vmatprep.mubr.msk.f32.mxu1 %vm3906_vm1, %v3905_v0  ;;  %v3725_v44 = vpack.c.bf16 %v3124_v43, %v3123_v42 }
0x17d9   :  { %v2518_v45 = vpop.f32.mrb[32].mxu1 }
0x17da   :  { %v3638_v46 = vpop.f32.mrb[33].mxu1  ;;  %3642 = vmatmul.mubr.msk.f32.vlgmr.msra.gmra.mrb[26].mxu0 %vm167_vm2, %v2518_v45  ;;  %v3206_v45 = vld [vmem:[%s4380_s6] sm:$0xff] }
0x17db   :  { %3651 = vmatprep.mubr.msk.f32.mxu0 %vm3906_vm1, %v3905_v0  ;;  %v3207_v46 = vld [vmem:[%s4380_s6 + $0x8] sm:$0xff] }
0x17dd   :  { %v2675_v47 = vpop.f32.mrb[34].mxu1 }
0x17de   :  { %v3648_v48 = vpop.f32.mrb[35].mxu1  ;;  %v2679_v49 = vsel %vm242_vm3, %v2675_v47, -inf }
0x17df   :  { %2680 = vmax.xlane.f32.xlu0 %v2679_v49  ;;  %v3728_v48 = vpack.c.bf16 %v3207_v46, %v3206_v45  ;;  %v3209_v49 = vld [vmem:[%s4380_s6 + $0x18] sm:$0xff] }
0x17f5   :  { %2690 = vrot.lane.b32.xlu0 %v4235_v4, %s3913_s22 }
0x17f9   :  { %2845 = vrot.lane.b32.xlu0 %v4066_v26, %s3933_s4 }
0x186c   :  { %v2681_v50 = vpop.xlane.xlu0 %2680 }
0x186d   :  { %v2682_v51 = vsub.f32 %v2675_v47, %v2681_v50  ;;  %v3208_v47 = vld [vmem:[%s4380_s6 + $0x10] sm:$0xff] }
0x186e   :  { %v3731_v50 = vpack.c.bf16 %v3209_v49, %v3208_v47 }
0x186f   :  { %v2683_v52 = vmul.f32 1.442695, %v2682_v51 }
0x1870   :  { %v2691_v53 = vpop.permute.xlu0 %2690 }
0x1871   :  { %3814 = vpow2.f32 %v2683_v52  ;;  %3650 = vmatpush3.msra.mxu0 %v2691_v53 }
0x1872   :  { %3659 = vmatprep.subr.mxu0 %v3905_v0 }
0x1874   :  { %v2846_v63 = vpop.permute.xlu0 %2845 }
0x187b   :  { %v3815_v54 = vpop.eup %3814 }
0x187c   :  { %v2685_v55 = vsel %vm242_vm3, %v3815_v54, 0.0 }
0x187d   :  { %2686 = vadd.xlane.f32.xlu1 %v2685_v55  ;;  %v3398_v55 = vld [vmem:[%s4381_s7 + $0x1] ss:$0 sm:$0xff] }
0x188e   :  { %2847 = vrot.lane.b32.xlu1 %v4066_v26, %s3934_s18  ;;  %v2767_v26 = vld [vmem:[#allocation2 + $0x28] sm:$0xf] }
0x188f   :  { %3655 = vmatpush3.msk.msra.mxu1 %vm501_vm4, %v2767_v26  ;;  %v3400_v26 = vld [vmem:[%s4379_s5] ss:$0 sm:$0xff] }
0x1890   :  { %3664 = vmatprep.subr.mxu1 %v3905_v0 }
0x18ad   :  { %v2596_v56 = vpop.f32.mrb[26].mxu0 }
0x18ae   :  { %v2600_v57 = vadd.f32 %v2596_v56, %v2355_v37  ;;  %v3643_v58 = vpop.f32.mrb[27].mxu0  ;;  %v3719_v37 = vpack.c.bf16 %v3120_v36, %v3119_v35 }
0x190a   :  { %v2687_v59 = vpop.xlane.xlu1 %2686 }
0x190b   :  { %3816 = vrcp.f32 %v2687_v59 }
0x190e   :  { %v2848_v62 = vpop.permute.xlu1 %2847 }
0x1915   :  { %v3817_v60 = vpop.eup %3816 }
0x1916   :  { %v2689_v61 = vmul.f32 %v3817_v60, %v3815_v54  ;;  %v3210_v60 = vld [vmem:[%s4380_s6 + $0x20] sm:$0xff] }
0x1918   :  { %3652 = vmatmul.mubr.msk.f32.vlgmr.msra.gmra.mrb[28].mxu0 %vm242_vm3, %v2689_v61  ;;  %v3211_v61 = vld [vmem:[%s4380_s6 + $0x28] sm:$0xff] }
0x1919   :  { %3660 = vmatpush3.xpose.msk.msra.mxu0 %vm167_vm2, %v2848_v62  ;;  %3661 = vmatprep.mubr.msk.f32.mxu0 %vm3906_vm1, %v3905_v0  ;;  %v3734_v62 = vpack.c.bf16 %v3211_v61, %v3210_v60 }
0x191a   :  { %3669 = vmatprep.subr.mxu0 %v3905_v0 }
0x191c   :  { %3662 = vmatmul.mubr.msk.f32.vlgmr.msra.gmra.mrb[30].mxu0 %vm167_vm2, %v2846_v63  ;;  %v3212_v63 = vld [vmem:[%s4380_s6 + $0x30] sm:$0x3] }
0x191d   :  { %3671 = vmatprep.mubr.msk.f32.mxu0 %vm3906_vm1, %v3905_v0  ;;  %3670 = vmatpush3.msk.msra.mxu0 %vm501_vm4, %v3011_v10 }
0x191e   :  { %3727 = vmatprep.subr.bf16.mxu0 %v3935_v38 }
0x19eb   :  { %v2762_v1 = vpop.f32.mrb[28].mxu0 }
0x19ec   :  { %v3653_v2 = vpop.f32.mrb[29].mxu0  ;;  %3657 = vmatmul.mubr.msk.f32.vlgmr.msra.gmra.mrb[36].mxu1 %vm167_vm2, %v2762_v1 }
0x19ed   :  { %3666 = vmatprep.mubr.msk.f32.mxu1 %vm3906_vm1, %v3905_v0 }
0x19ef   :  { %v2919_v3 = vpop.f32.mrb[30].mxu0 }
0x19f0   :  { %v3663_v5 = vpop.f32.mrb[31].mxu0  ;;  %v2923_v6 = vsel %vm242_vm3, %v2919_v3, -inf }
0x19f1   :  { %2924 = vmax.xlane.f32.xlu0 %v2923_v6 }
0x1a07   :  { %2934 = vrot.lane.b32.xlu0 %v4235_v4, %s3916_s25 }
0x1a7e   :  { %v2925_v7 = vpop.xlane.xlu0 %2924 }
0x1a7f   :  { %v2926_v8 = vsub.f32 %v2919_v3, %v2925_v7 }
0x1a81   :  { %v2927_v21 = vmul.f32 1.442695, %v2926_v8 }
0x1a82   :  { %v2935_v23 = vpop.permute.xlu0 %2934 }
0x1a83   :  { %3818 = vpow2.f32 %v2927_v21  ;;  %3665 = vmatpush3.msra.mxu1 %v2935_v23 }
0x1a84   :  { %3718 = vmatprep.subr.bf16.mxu1 %v3935_v38 }
0x1a8d   :  { %v3819_v27 = vpop.eup %3818 }
0x1a8e   :  { %v2929_v9 = vsel %vm242_vm3, %v3819_v27, 0.0 }
0x1a8f   :  { %2930 = vadd.xlane.f32.xlu1 %v2929_v9 }
0x1abf   :  { %v2840_v11 = vpop.f32.mrb[36].mxu1 }
0x1ac0   :  { %v2844_v12 = vadd.f32 %v2840_v11, %v2600_v57  ;;  %v3658_v13 = vpop.f32.mrb[37].mxu1  ;;  %v3399_v57 = vld [vmem:[%s4381_s7 + $0x2] ss:$0 sm:$0xff] }
0x1b1c   :  { %v2931_v14 = vpop.xlane.xlu1 %2930 }
0x1b1d   :  { %3820 = vrcp.f32 %v2931_v14 }
0x1b27   :  { %v3821_v15 = vpop.eup %3820 }
0x1b28   :  { %v2933_v4 = vmul.f32 %v3821_v15, %v3819_v27 }
0x1b2a   :  { %3667 = vmatmul.mubr.msk.f32.vlgmr.msra.gmra.mrb[38].mxu1 %vm242_vm3, %v2933_v4 }
0x1b2b   :  { %3686 = vmatprep.mubr.msk.f32.mxu1 %vm3906_vm1, %v3905_v0  ;;  %3720 = vmatpush3.bf16.msra.mxu1 %v3719_v37 }
0x1b2c   :  { %3721 = vmatprep.subr.bf16.mxu1 %v3935_v38 }
0x1b2f   :  { %3723 = vmatpush3.bf16.msra.mxu1 %v3722_v41 }
0x1b30   :  { %3724 = vmatprep.subr.bf16.mxu1 %v3935_v38 }
0x1b33   :  { %3726 = vmatpush3.bf16.msra.mxu1 %v3725_v44 }
0x1bfd   :  { %v3006_v16 = vpop.f32.mrb[38].mxu1 }
0x1bfe   :  { %v3668_v17 = vpop.f32.mrb[39].mxu1  ;;  %3672 = vmatmul.mubr.msk.f32.vlgmr.msra.gmra.mrb[32].mxu0 %vm167_vm2, %v3006_v16  ;;  %v3405_v16 = vld [vmem:[%s4381_s7 + $0x4] ss:$0 sm:$0xff] }
0x1bff   :  { %3703 = vmatprep.mubr.msk.f32.mxu0 %vm3906_vm1, %v3905_v0  ;;  %3729 = vmatpush3.bf16.msra.mxu0 %v3728_v48 }
0x1c00   :  { %3730 = vmatprep.subr.bf16.mxu0 %v3935_v38 }
0x1c03   :  { %3732 = vmatpush3.bf16.msra.mxu0 %v3731_v50 }
0x1c04   :  { %3733 = vmatprep.subr.bf16.mxu0 %v3935_v38 }
0x1c07   :  { %3735 = vmatpush3.bf16.msra.mxu0 %v3734_v62 }
0x1c08   :  { %3701 = vmatprep.subr.mxu0 %v3905_v0  ;;  %v3402_v0 = vld [vmem:[%s4381_s7 + $0x3] ss:$0 sm:$0xff] }
0x1c0b   :  { %3702 = vmatpush3.msk.msra.mxu0 %vm3221_vm5, %v3212_v63 }
0x1cd1   :  { %v3084_v19 = vpop.f32.mrb[32].mxu0 }
0x1cd2   :  { %v3088_v20 = vadd.f32 %v3084_v19, %v2844_v12  ;;  %v3673_v22 = vpop.f32.mrb[33].mxu0 }
0x1cd4   :  { %v3093_v24 = vadd.f32 %v3397_v18, %v3088_v20  ;;  %v3406_v18 = vld [vmem:[%s4381_s7 + $0x5] ss:$0 sm:$0xff] }
0x1cd6   :  { %v3094_v28 = vadd.f32 %v3826_v25, %v3093_v24 }
0x1cd8   :  { %v3095_v29 = vsel %vm83_vm0, %v3094_v28, 0.0 }
0x1cd9   :  { %3096 = vadd.xlane.f32.xlu1 %v3095_v29 }
0x1d66   :  { %v3097_v30 = vpop.xlane.xlu1 %3096 }
0x1d67   :  { %v3099_v31 = vmul.f32 0.020833334, %v3097_v30 }
0x1d69   :  { %v3100_v32 = vsub.f32 %v3094_v28, %v3099_v31 }
0x1d6b   :  { %v3101_v33 = vmul.f32 %v3100_v32, %v3100_v32 }
0x1d6d   :  { %v3102_v34 = vsel %vm83_vm0, %v3101_v33, 0.0 }
0x1d6e   :  { %3103 = vadd.xlane.f32.xlu1 %v3102_v34 }
0x1dfb   :  { %v3104_v51 = vpop.xlane.xlu1 %3103 }
0x1dfc   :  { %v3105_v52 = vmul.f32 0.020833334, %v3104_v51 }
0x1dfe   :  { %v3106_v53 = vadd.f32 1e-05, %v3105_v52 }
0x1e00   :  { %3822 = vrsqrt.f32 %v3106_v53 }
0x1e0a   :  { %v3823_v54 = vpop.eup %3822 }
0x1e0b   :  { %v3108_v56 = vmul.f32 %v3823_v54, %v3100_v32 }
0x1e0d   :  { %v3113_v58 = vmul.f32 %v3398_v55, %v3108_v56 }
0x1e0f   :  { %v3118_v59 = vadd.f32 %v3399_v57, %v3113_v58 }
0x1e11   :  { %3687 = vmatmul.mubr.msk.f32.vlgmr.msra.gmra.mrb[40].mxu1 %vm83_vm0, %v3118_v59 }
0x1ee4   :  { %v3201_v1 = vpop.f32.mrb[40].mxu1 }
0x1ee5   :  { %v3202_v2 = vadd.f32 %v3400_v26, %v3201_v1  ;;  %v3688_v3 = vpop.f32.mrb[41].mxu1 }
0x1ee7   :  { %v3205_v5 = vmax.f32 %v3202_v2, 0.0 }
0x1ee9   :  { %3704 = vmatmul.mubr.msk.f32.vlgmr.msra.gmra.mrb[34].mxu0 %vm3217_vm6, %v3205_v5 }
0x1fbc   :  { %v3291_v6 = vpop.f32.mrb[34].mxu0 }
0x1fbd   :  { %v3292_v7 = vadd.f32 %v3402_v0, %v3291_v6  ;;  %v3705_v8 = vpop.f32.mrb[35].mxu0 }
0x1fbf   :  { %v3295_v21 = vadd.f32 %v3292_v7, %v3118_v59 }
0x1fc1   :  { %v3296_v23 = vsel %vm83_vm0, %v3295_v21, 0.0 }
0x1fc2   :  { %3297 = vadd.xlane.f32.xlu0 %v3296_v23 }
0x204f   :  { %v3298_v27 = vpop.xlane.xlu0 %3297 }
0x2050   :  { %v3299_v9 = vmul.f32 0.020833334, %v3298_v27 }
0x2052   :  { %v3300_v10 = vsub.f32 %v3295_v21, %v3299_v9 }
0x2054   :  { %v3301_v11 = vmul.f32 %v3300_v10, %v3300_v10 }
0x2056   :  { %v3302_v12 = vsel %vm83_vm0, %v3301_v11, 0.0 }
0x2057   :  { %3303 = vadd.xlane.f32.xlu1 %v3302_v12 }
0x20e4   :  { %v3304_v13 = vpop.xlane.xlu1 %3303 }
0x20e5   :  { %v3305_v14 = vmul.f32 0.020833334, %v3304_v13 }
0x20e7   :  { %v3306_v15 = vadd.f32 1e-05, %v3305_v14 }
0x20e9   :  { %3824 = vrsqrt.f32 %v3306_v15 }
0x20f3   :  { %v3825_v4 = vpop.eup %3824 }
0x20f4   :  { %v3308_v17 = vmul.f32 %v3825_v4, %v3300_v10 }
0x20f6   :  { %v3313_v19 = vmul.f32 %v3405_v16, %v3308_v17 }
0x20f8   :  { %v3318_v20 = vadd.f32 %v3406_v18, %v3313_v19 }
0x20fa   :  { %3319 = vst.msk [vmem:[#allocation7] sm:$0xff] %vm83_vm0, %v3318_v20 }
0x20fb   :  { %3882 = shalt.err (!%p3879_p6)
}
0x20fc   :  { %s3883_s23 = scalar_lea.hbm %s4382_s8, 128 }
0x20fd   :  { %p3884_p7 = scmp.ne.s32.totalorder %s4382_s8, %s3883_s23  ;;  %p3887_p8 = scmp.lt.u32.totalorder %s3883_s23, %s4382_s8 }
0x20ff   :  { %p3889_p9 = pnand %p3887_p8, %p3884_p7 }
0x2101   :  { %3892 = shalt.err (!%p3889_p9)
}
0x2102   :  { %3329 = dma.vmem_to_hbm [thread:$0]  %s3327_s20, 128, %s4382_s8, [#allocation4]  }
0x2103   :  { %3897 = dma.done.wait [#allocation4], 128  }
0x2104   :  { %3898 = vsyncadd [#allocation4], 4294967168 }
0x2105   :  { %3333 = vsyncpa [#allocation3], 1 }
0x2106   :  { %3334 = vsyncpa [#allocation6], 1 }
0x2107   :  { %3335 = vsyncpa [#allocation4], 1 }

</bundles_post_ra>
